<compile_context>
chip_gen: v7x
topology: tpu7x:2x2x1
jax: 0.10.0
libtpu: 0.0.40
codegen_flags: <defaults>
</compile_context>

<pallas_src>
import functools

import jax
import jax.numpy as jnp
from jax.experimental import pallas as pl
from jax.experimental.pallas import tpu as pltpu


# -----------------------------------------------------------------------------
# Kernel
# -----------------------------------------------------------------------------
def _upsample2x_kernel(x_ref, o_ref):
    # x_ref: (TB, TH, W)   input block (TB planes x TH rows of one row-block)
    # o_ref: (TB, TH, 4W)  matching block of the output VIEWED as (BC, H, 4W);
    #        out_view[n, i, :] = [repeat(x[n, i, :], 2), repeat(x[n, i, :], 2)]
    #        which reshapes contiguously to the (BC, 2H, 2W) nearest upsample.
    t = x_ref[...]                                   # (TB, TH, W)
    u = jnp.repeat(t, 2, axis=-1)                    # (TB, TH, 2W)  W doubling (lanes)
    o_ref[...] = jnp.concatenate([u, u], axis=-1)    # (TB, TH, 4W)  H doubling via row-pair view


# -----------------------------------------------------------------------------
# Tiling heuristics (per-chip VMEM-aware)
# -----------------------------------------------------------------------------
def _vmem_capacity_bytes():
    try:
        info = pltpu.get_tpu_info()
        cap = int(getattr(info, "vmem_capacity_bytes", 0) or 0)
        if cap > 0:
            return cap
    except Exception:
        pass
    return 64 * 1024 * 1024  # conservative default (v7x per-TC VMEM)


def _pick_tiles(BC, H, W, dtype):
    """Choose (TB, TH, vmem_limit_bytes) for the (BC,H,W) -> (BC,H,4W) kernel."""
    itemsize = jnp.dtype(dtype).itemsize
    packing = max(1, 4 // itemsize)          # elements per 32-bit sublane word
    sub = 8 * packing                        # sublane alignment: 8 / 16 / 32

    vmem_cap = _vmem_capacity_bytes()
    # Per-step footprint ~ 2*in + 2*out = ~10x the input tile (double-buffered).
    in_budget = max(512 * 1024, vmem_cap // 20)          # ~3 MiB v7x, ~6 MiB v5e/v6e
    vmem_limit = int(min(vmem_cap * 3 // 4, 112 * 1024 * 1024))

    row_bytes = W * itemsize
    plane_bytes = H * row_bytes

    if plane_bytes <= in_budget:
        # Whole planes per step; stack TB planes per block.
        TH = H
        tb_cap = max(1, min(BC, in_budget // max(plane_bytes, 1)))
        if BC >= 2:
            tb_cap = min(tb_cap, BC // 2)    # keep >=2 parallel blocks (v7x megacore)
        TB = 1
        for cand in range(tb_cap, 0, -1):    # largest divisor of BC <= tb_cap
            if BC % cand == 0:
                TB = cand
                break
    else:
        # One plane at a time; tile rows, sublane-aligned.
        TB = 1
        if H <= sub:
            TH = H                           # block dim == full dim -> always legal
        else:
            th_cap = max(sub, (in_budget // max(row_bytes, 1)) // sub * sub)
            th_cap = min(th_cap, (H // sub) * sub)
            TH = th_cap                      # remainder block (if any) handled by Pallas
            t = th_cap
            while t >= sub:                  # prefer a divisor of H (no remainder block)
                if H % t == 0:
                    TH = t
                    break
                t -= sub
    return TB, TH, vmem_limit


# -----------------------------------------------------------------------------
# Cached builder + public wrapper (matches UpsampleLayer.forward exactly)
# -----------------------------------------------------------------------------
@functools.lru_cache(maxsize=None)
def _build_upsample_fn(B, C, H, W, dtype_name):
    dtype = jnp.dtype(dtype_name)
    BC = B * C
    TB, TH, vmem_limit = _pick_tiles(BC, H, W, dtype)
    grid = (pl.cdiv(BC, TB), pl.cdiv(H, TH))
    cost = pl.CostEstimate(flops=0, transcendentals=0,
                           bytes_accessed=5 * BC * H * W * dtype.itemsize)

    upsample = pl.pallas_call(
        _upsample2x_kernel,
        out_shape=jax.ShapeDtypeStruct((BC, H, 4 * W), dtype),
        grid=grid,
        in_specs=[pl.BlockSpec((TB, TH, W), lambda n, h: (n, h, 0))],
        out_specs=pl.BlockSpec((TB, TH, 4 * W), lambda n, h: (n, h, 0)),
        compiler_params=pltpu.CompilerParams(
            dimension_semantics=("parallel", "parallel"),
            vmem_limit_bytes=vmem_limit),
        cost_estimate=cost,
    )

    def fn(x):
        y = upsample(x.reshape(BC, H, W))          # (BC, H, 4W)
        return y.reshape(B, C, 2 * H, 2 * W)       # free contiguous reshape

    return jax.jit(fn)


def upsample_nearest_2x(x):
    """Equivalent of UpsampleLayer.forward: nearest 2x upsample, NCHW in/out."""
    B, C, H, W = x.shape
    fn = _build_upsample_fn(B, C, H, W, str(jnp.dtype(x.dtype)))
    return fn(x)


# -----------------------------------------------------------------------------
# Self-test
# -----------------------------------------------------------------------------
if __name__ == "__main__":
    key = jax.random.PRNGKey(0)

    # Primary test: matches the PyTorch module's expected input layout.
    x = jax.random.normal(key, (2, 4, 16, 16), dtype=jnp.float32)
    y = jax.block_until_ready(upsample_nearest_2x(x))
    ref = jnp.repeat(jnp.repeat(x, 2, axis=2), 2, axis=3)
    assert y.shape == (2, 4, 32, 32), y.shape
    assert y.dtype == x.dtype
    assert jnp.array_equal(y, ref), "mismatch vs reference nearest upsample"

    # Secondary test: bf16 + non-power-of-two spatial dims (lane-dense 4W path).
    x2 = jax.random.normal(jax.random.PRNGKey(0), (1, 3, 40, 96), dtype=jnp.bfloat16)
    y2 = jax.block_until_ready(upsample_nearest_2x(x2))
    ref2 = jnp.repeat(jnp.repeat(x2, 2, axis=2), 2, axis=3)
    assert y2.shape == (1, 3, 80, 192), y2.shape
    assert y2.dtype == x2.dtype
    assert jnp.array_equal(y2, ref2), "bf16 mismatch vs reference nearest upsample"

    print("KERNEL_OK")
</pallas_src>

<mosaic_0001>
module attributes {stable_mosaic.version = 11 : i64} {
  func.func @_upsample2x_kernel(%arg0: i32, %arg1: i32, %arg2: memref<4x16x16xf32, #tpu.memory_space<vmem>>, %arg3: memref<4x16x64xf32, #tpu.memory_space<vmem>>) attributes {dimension_semantics = [#tpu.dimension_semantics<parallel>, #tpu.dimension_semantics<parallel>], iteration_bounds = array<i64: 2, 1>, scalar_prefetch = 0 : i64, scratch_operands = 0 : i64, tpu.core_type = #tpu.core_type<tc>, window_params = [{transform_indices = @transform_0, window_bounds = array<i64: 4, 16, 16>}, {transform_indices = @transform_1, window_bounds = array<i64: 4, 16, 64>}]} {
    %c0 = arith.constant 0 : index
    %c0_0 = arith.constant 0 : index
    %c0_1 = arith.constant 0 : index
    %0 = vector.load %arg2[%c0, %c0_0, %c0_1] : memref<4x16x16xf32, #tpu.memory_space<vmem>>, vector<4x16x16xf32>
    %1 = vector.shape_cast %0 : vector<4x16x16xf32> to vector<4x16x16x1xf32>
    %2 = vector.broadcast %1 : vector<4x16x16x1xf32> to vector<4x16x16x2xf32>
    %3 = vector.shape_cast %2 : vector<4x16x16x2xf32> to vector<4x16x32xf32>
    %4 = tpu.concatenate %3, %3 in 2 : vector<4x16x32xf32>, vector<4x16x32xf32> -> vector<4x16x64xf32>
    %c0_2 = arith.constant 0 : index
    %c0_3 = arith.constant 0 : index
    %c0_4 = arith.constant 0 : index
    %5 = vector.load %arg3[%c0_2, %c0_3, %c0_4] : memref<4x16x64xf32, #tpu.memory_space<vmem>>, vector<4x16x64xf32>
    tpu.vector_store %arg3[%c0_2, %c0_3, %c0_4], %4 {strides = array<i32>} : memref<4x16x64xf32, #tpu.memory_space<vmem>>, vector<4x16x64xf32>,
    return
  }
  func.func @transform_0(%arg0: i32, %arg1: i32) -> (i32, i32, i32) {
    %c0_i32 = arith.constant 0 : i32
    %c0_i32_0 = arith.constant 0 : i32
    return %arg0, %arg1, %c0_i32 : i32, i32, i32
  }
  func.func @transform_1(%arg0: i32, %arg1: i32) -> (i32, i32, i32) {
    %c0_i32 = arith.constant 0 : i32
    %c0_i32_0 = arith.constant 0 : i32
    return %arg0, %arg1, %c0_i32 : i32, i32, i32
  }
}

</mosaic_0001>

<bundles_post_ra>
// kernel: fn.1
= control target key start
LH: loop header
LB: loop body
LE: loop exit
PB: predicated region body
PF: predicated region fallthrough
CT: control target
= control target key end

     0   :  { %6 = vsyncpa [#allocation3], 0  ;;  %s6321_s0 = inlined_call_operand.hbm [shape: f32[8,16,16], index: 0, kind: input, shape index: {}]   ;;  %s6322_s1 = inlined_call_operand.vmem [shape: f32[8,16,64], index: 1, kind: output, shape index: {}]  }
   0x1   :  { %8 = vsyncpa [#allocation3 + $0x1], 0  ;;  %s4027_s6 = smov 0   ;;  %s4029_s7 = smov 0  }
   0x2   :  { %s4031_s8 = smov 0   ;;  %s4033_s9 = smov 0  }
   0x3   :  { %s4035_s10 = smov 0   ;;  %s4037_s11 = smov 0  }
   0x4 LB: > { %s3821_s12 = sadd.s32 4294967295, %s3994_s11   ;;  %s26_s13 = sadd.s32 1, %s3990_s10  ;;  %s3994_s11 = sphi %s4037_s11, %s14_s11   ;;  %s3990_s10 = sphi %s4035_s10, %s6722_s10   ;;  %s3986_s9 = sphi %s4033_s9, %s6721_s9   ;;  %s3982_s8 = sphi %s4031_s8, %s6720_s8   ;;  %s3978_s7 = sphi %s4029_s7, %s6719_s7   ;;  %s3974_s6 = sphi %s4027_s6, %s6718_s6  }
   0x5   : > { %p28_p0 = scmp.ge.s32.totalorder %s26_s13, 2  ;;  %s35_s14 = sadd.s32 1, %s3982_s8 }
   0x6   : > { %p42_p1 = scmp.ne.s32.totalorder %s3982_s8, %s3978_s7  ;;  %p43_p2 = scmp.eq.s32.totalorder %s3994_s11, 0 }
   0x7   : > { %s6724_s13 = smov (%p28_p0, %s26_s13), 0  ;;  %p48_p4 = scmp.ne.s32.totalorder %s3978_s7, %s3974_s6 }
   0x8   : > { %p4063_p3 = por %p43_p2, %p42_p1  ;;  %s30_s16 = ssub.s32 %s3990_s10, %s6724_s13 }
   0x9   : > { %p49_p5 = scmp.eq.s32.totalorder %s3821_s12, 0  ;;  %p33_p6 = scmp.eq.s32.totalorder %s30_s16, 0 }
   0xa   : > { %p3845_p8 = scmp.lt.s32.totalorder %s3994_s11, 2  ;;  %s100_s19 = sand.u32 1, %s3982_s8  }
   0xb   : > { %p4070_p7 = por %p49_p5, %p48_p4  ;;  %s3837_s20 = sshll.u32 %s3990_s10, 10 }
   0xc   : > { %s4076_s18 = scalar_select %p33_p6, %s3982_s8, %s35_s14  }
   0xd   : > { %s3825_s21 = sshll.u32 %s100_s19, 6  ;;  %s4083_s24 = scalar_lea.hbm %s6321_s0, %s3837_s20 }
   0xe   : > { %s104_s25 = scalar_lea.vmem [#allocation2], %s3825_s21  ;;  %p4087_p9 = pnand %p3845_p8, %p4063_p3 }
   0xf   : > { %s114_s26 = sshll.u32 %s104_s25, 4  ;;  %s4093_s28 = scalar_lea.sflag [#allocation3], %s100_s19  ;;  %s4091_s26 = int_to_ptr.vmem [resolvable:$true] %s114_s26 }
  0x10   : > { %s3914_s29 = scalar_lea.hbm %s4083_s24, 1024  ;;  %p3916_p11 = pneg %p4087_p9 }
  0x11   : > { %p3915_p10 = scmp.ne.s32.totalorder %s4083_s24, %s3914_s29  ;;  %s3919_s3 = scalar_lea.hbm %s6321_s0, 2048 }
  0x12   : > { %p3920_p0 = scmp.lt.u32.totalorder %s4083_s24, %s6321_s0  ;;  %p3921_p1 = scmp.lt.u32.totalorder %s3919_s3, %s3914_s29 }
  0x13   : > { %p3917_p12 = pnand %p3916_p11, %p3915_p10  ;;  %p3923_p3 = scmp.lt.u32.totalorder %s3914_s29, %s4083_s24 }
  0x14   : > { %p3922_p2 = por %p3921_p1, %p3920_p0 }
  0x15   : > { %p3918_p13 = pneg %p3917_p12 }
  0x16   : > { %p3924_p4 = por %p3923_p3, %p3922_p2 }
  0x18   : > { %p3925_p5 = pnand %p3924_p4, %p3918_p13 }
  0x1a   : > { %3928 = shalt.err (!%p3925_p5)
}
  0x1b   : > { %s3929_s6 = scalar_lea.vmem %s4091_s26, 1024  ;;  %s3996_s12 = smov [#allocation2]  }
  0x1c   : > { %p3930_p6 = scmp.ne.s32.totalorder %s4091_s26, %s3929_s6  ;;  %s3934_s14 = sshll.u32 %s3996_s12, 4  ;;  %s3935_s14 = int_to_ptr.vmem [resolvable:$false] %s3934_s14 }
  0x1d   : > { %s3936_s15 = scalar_lea.vmem %s3935_s14, 2048  ;;  %p3937_p12 = scmp.lt.s32.totalorder %s4091_s26, %s3935_s14 }
  0x1e   : > { %p3932_p8 = pnand %p3930_p6, %p3916_p11  ;;  %p3938_p0 = scmp.lt.s32.totalorder %s3936_s15, %s3929_s6 }
  0x20   : > { %p3933_p10 = pneg %p3932_p8  ;;  %p3939_p1 = por %p3938_p0, %p3937_p12 }
  0x22   : > { %p3940_p2 = pnand %p3939_p1, %p3933_p10 }
  0x24   : > { %3943 = shalt.err (!%p3940_p2)
}
  0x25   : > { %s3997_s16 = smov 128   ;;  %s3998_s19 = smov 8  }
  0x26   : > { %3844 = dma.hbm_to_vmem [thread:$0]  (!%p4087_p9), %s4083_s24, 1024, %s4091_s26, %s4093_s28, %s3997_s16, %s3997_s16, %s3998_s19  }
  0x27   : > { %p3829_p11 = scmp.ge.s32.totalorder %s3994_s11, 1  ;;  %p122_p13 = scmp.lt.s32.totalorder %s3994_s11, 3 }
  0x29   : > { %p123_p3 = pnand %p3829_p11, %p122_p13 }
  0x2b   : > { %126 = sbr.rel (%p123_p3) target bundleno = 896 (0x380), region = 24 }
  0x32   : > { %s128_s20 = sand.u32 1, %s3978_s7  }
  0x33   : > { %s3830_s21 = sshll.u32 %s128_s20, 6  ;;  %s129_s22 = scalar_lea.sflag [#allocation3], %s128_s20 }
  0x34   : > { %s4124_s23 = scalar_lea.vmem [#allocation2], %s3830_s21 }
  0x35   : > { %3969 = dma.done.wait (%p4070_p7), %s129_s22, 1024  }
  0x36   : > { %3971 = vsyncadd (%p4070_p7), %s129_s22, 4294966272  ;;  %v178_v0 = vlaneseq  ;;  %v170_v4 = vld [vmem:[%s4124_s23] sm:$0xff]  ;;  %v171_v19 = vld [vmem:[%s4124_s23 + $0x8] sm:$0xff]  ;;  %v3999_v47 = vmov 1983009808   ;;  %s4001_s17 = smov 2  }
  0x37   : > { %v172_v28 = vld [vmem:[%s4124_s23 + $0x10] sm:$0xff]  ;;  %v173_v37 = vld [vmem:[%s4124_s23 + $0x18] sm:$0xff]  ;;  %v885_v48 = vunpack.c.l.s4 %v3999_v47  ;;  %v174_v52 = vld [vmem:[%s4124_s23 + $0x20] sm:$0xff]  ;;  %s4002_s24 = smov 4   ;;  %s4003_s25 = smov 6   ;;  %vm3538_vm0 = vcmask 15360  }
  0x38   : > { %v4130_v1 = vshrl.u32 %v178_v0, 7  ;;  %s4004_s26 = smov 8   ;;  %s4005_s27 = smov 10   ;;  %vm3547_vm1 = vcmask 31744   ;;  %vm3556_vm2 = vcmask 48128   ;;  %vm3565_vm3 = vcmask 64512  }
  0x39   : > { %v886_v53 = vunpack.c.0.s8 %v885_v48  ;;  %v175_v48 = vld [vmem:[%s4124_s23 + $0x28] sm:$0xff]  ;;  %s4006_s28 = smov 12   ;;  %s4007_s29 = smov 14   ;;  %vm3574_vm4 = vcmask 80896   ;;  %vm3583_vm5 = vcmask 97280   ;;  %vm3592_vm6 = vcmask 113664  }
  0x3a   : > { %v4133_v2 = vsub.s32 1, %v4130_v1  ;;  %v4136_v3 = vsub.s32 0, %v4130_v1  ;;  %v4142_v7 = vsub.s32 2, %v4130_v1  ;;  %v4146_v9 = vsub.s32 3, %v4130_v1  ;;  %s4008_s30 = smov 16   ;;  %s4009_s2 = smov 18  }
  0x3b   : > { %v4150_v11 = vsub.s32 4, %v4130_v1  ;;  %v4154_v13 = vsub.s32 5, %v4130_v1  ;;  %v4158_v15 = vsub.s32 6, %v4130_v1  ;;  %v4162_v17 = vsub.s32 7, %v4130_v1  ;;  %s4010_s3 = smov 20   ;;  %s4011_s4 = smov 22  }
  0x3c   : > { %v192_v5 = vrot.slane %v170_v4, %v4133_v2  ;;  %v181_v6 = vrot.slane %v170_v4, %v4136_v3  ;;  %v203_v8 = vrot.slane %v170_v4, %v4142_v7  ;;  %v214_v10 = vrot.slane %v170_v4, %v4146_v9  ;;  %s4012_s5 = smov 24   ;;  %s4013_s6 = smov 26  }
  0x3d   : > { %v225_v12 = vrot.slane %v170_v4, %v4150_v11  ;;  %v236_v14 = vrot.slane %v170_v4, %v4154_v13  ;;  %v247_v16 = vrot.slane %v170_v4, %v4158_v15  ;;  %v258_v18 = vrot.slane %v170_v4, %v4162_v17  ;;  %s4014_s12 = smov 28   ;;  %s4015_s14 = smov 30  }
  0x3e   : > { %194 = vbcast.lane.b32.xlu1 %v192_v5, 256  ;;  %183 = vbcast.lane.b32.xlu0 %v181_v6, 256  ;;  %v269_v20 = vrot.slane %v171_v19, %v4136_v3  ;;  %v280_v21 = vrot.slane %v171_v19, %v4133_v2  ;;  %v291_v22 = vrot.slane %v171_v19, %v4142_v7  ;;  %vm3601_vm7 = vcmask 130048   ;;  %s4016_s15 = smov 32   ;;  %s3831_s16 = sshll.u32 %s3986_s9, 2 }
  0x3f   : > { %v302_v23 = vrot.slane %v171_v19, %v4146_v9  ;;  %v313_v24 = vrot.slane %v171_v19, %v4150_v11  ;;  %v324_v25 = vrot.slane %v171_v19, %v4154_v13  ;;  %v335_v26 = vrot.slane %v171_v19, %v4158_v15  ;;  %p160_p7 = scmp.lt.s32.totalorder %s3831_s16, 7 }
  0x40   : > { %v346_v27 = vrot.slane %v171_v19, %v4162_v17  ;;  %v357_v29 = vrot.slane %v172_v28, %v4136_v3  ;;  %v368_v30 = vrot.slane %v172_v28, %v4133_v2  ;;  %v379_v31 = vrot.slane %v172_v28, %v4142_v7 }
  0x41   : > { %v390_v32 = vrot.slane %v172_v28, %v4146_v9  ;;  %v401_v33 = vrot.slane %v172_v28, %v4150_v11  ;;  %v412_v34 = vrot.slane %v172_v28, %v4154_v13  ;;  %v423_v35 = vrot.slane %v172_v28, %v4158_v15  ;;  %s6726_s16 = smov (!%p160_p7, %s3831_s16), 7 }
  0x42   : > { %198 = vbcast.lane.b32.xlu1 %v192_v5, 264  ;;  %187 = vbcast.lane.b32.xlu0 %v181_v6, 264  ;;  %v434_v36 = vrot.slane %v172_v28, %v4162_v17  ;;  %v445_v38 = vrot.slane %v173_v37, %v4136_v3  ;;  %v456_v39 = vrot.slane %v173_v37, %v4133_v2  ;;  %vm3610_vm8 = vcmask 146432   ;;  %s3838_s19 = sshll.u32 %s6726_s16, 4 }
  0x43   : > { %v467_v40 = vrot.slane %v173_v37, %v4142_v7  ;;  %v478_v41 = vrot.slane %v173_v37, %v4146_v9  ;;  %v489_v42 = vrot.slane %v173_v37, %v4150_v11  ;;  %v500_v43 = vrot.slane %v173_v37, %v4154_v13  ;;  %s167_s22 = scalar_lea.vmem %s6322_s1, %s3838_s19 }
  0x44   : > { %v511_v46 = vrot.slane %v173_v37, %v4158_v15  ;;  %v522_v51 = vrot.slane %v173_v37, %v4162_v17  ;;  %v533_v56 = vrot.slane %v174_v52, %v4136_v3  ;;  %v4207_v57 = vsub.s32 %v886_v53, %v4130_v1 }
  0x45   : > { %v544_v62 = vrot.slane %v174_v52, %v4133_v2  ;;  %vm3619_vm9 = vcmask 162816   ;;  %vm3628_vm10 = vcmask 179200   ;;  %vm3637_vm11 = vcmask 195584  }
  0x46   : > { %209 = vbcast.lane.b32.xlu1 %v203_v8, 264  ;;  %205 = vbcast.lane.b32.xlu0 %v203_v8, 256  ;;  %v555_v8 = vrot.slane %v174_v52, %v4142_v7  ;;  %vm3646_vm12 = vcmask 211968   ;;  %vm3655_vm13 = vcmask 228352   ;;  %vm3664_vm14 = vcmask 244736  }
  0x47   : > { %vm3705_vm15 = vcmask 261120  }
  0x4a   : > { %220 = vbcast.lane.b32.xlu1 %v214_v10, 264  ;;  %216 = vbcast.lane.b32.xlu0 %v214_v10, 256 }
  0x4e   : > { %231 = vbcast.lane.b32.xlu1 %v225_v12, 264  ;;  %227 = vbcast.lane.b32.xlu0 %v225_v12, 256 }
  0x52   : > { %242 = vbcast.lane.b32.xlu1 %v236_v14, 264  ;;  %238 = vbcast.lane.b32.xlu0 %v236_v14, 256  ;;  %v566_v14 = vrot.slane %v174_v52, %v4146_v9 }
  0x56   : > { %253 = vbcast.lane.b32.xlu1 %v247_v16, 264  ;;  %249 = vbcast.lane.b32.xlu0 %v247_v16, 256  ;;  %v4000_v16 = vmov 1934713408  }
  0x5a   : > { %264 = vbcast.lane.b32.xlu1 %v258_v18, 264  ;;  %260 = vbcast.lane.b32.xlu0 %v258_v18, 256  ;;  %v949_v18 = vunpack.c.l.s4 %v4000_v16  ;;  %v643_v16 = vrot.slane %v175_v48, %v4142_v7 }
  0x5e   : > { %275 = vbcast.lane.b32.xlu1 %v269_v20, 264  ;;  %271 = vbcast.lane.b32.xlu0 %v269_v20, 256 }
  0x62   : > { %286 = vbcast.lane.b32.xlu1 %v280_v21, 264  ;;  %282 = vbcast.lane.b32.xlu0 %v280_v21, 256  ;;  %v577_v21 = vrot.slane %v174_v52, %v4150_v11 }
  0x66   : > { %297 = vbcast.lane.b32.xlu1 %v291_v22, 264  ;;  %293 = vbcast.lane.b32.xlu0 %v291_v22, 256  ;;  %v950_v22 = vunpack.c.0.s8 %v949_v18 }
  0x6a   : > { %308 = vbcast.lane.b32.xlu1 %v302_v23, 264  ;;  %304 = vbcast.lane.b32.xlu0 %v302_v23, 256 }
  0x6e   : > { %319 = vbcast.lane.b32.xlu1 %v313_v24, 264  ;;  %315 = vbcast.lane.b32.xlu0 %v313_v24, 256 }
  0x72   : > { %330 = vbcast.lane.b32.xlu1 %v324_v25, 264  ;;  %326 = vbcast.lane.b32.xlu0 %v324_v25, 256 }
  0x76   : > { %341 = vbcast.lane.b32.xlu1 %v335_v26, 264  ;;  %337 = vbcast.lane.b32.xlu0 %v335_v26, 256 }
  0x7a   : > { %352 = vbcast.lane.b32.xlu1 %v346_v27, 264  ;;  %348 = vbcast.lane.b32.xlu0 %v346_v27, 256  ;;  %v588_v27 = vrot.slane %v174_v52, %v4154_v13 }
  0x7e   : > { %363 = vbcast.lane.b32.xlu1 %v357_v29, 264  ;;  %359 = vbcast.lane.b32.xlu0 %v357_v29, 256  ;;  %v4246_v29 = vsub.s32 %v950_v22, %v4130_v1  ;;  %v654_v22 = vrot.slane %v175_v48, %v4146_v9 }
  0x82   : > { %374 = vbcast.lane.b32.xlu1 %v368_v30, 264  ;;  %370 = vbcast.lane.b32.xlu0 %v368_v30, 256 }
  0x86   : > { %385 = vbcast.lane.b32.xlu1 %v379_v31, 264  ;;  %381 = vbcast.lane.b32.xlu0 %v379_v31, 256 }
  0x8a   : > { %396 = vbcast.lane.b32.xlu1 %v390_v32, 264  ;;  %392 = vbcast.lane.b32.xlu0 %v390_v32, 256 }
  0x8e   : > { %407 = vbcast.lane.b32.xlu1 %v401_v33, 264  ;;  %403 = vbcast.lane.b32.xlu0 %v401_v33, 256 }
  0x92   : > { %418 = vbcast.lane.b32.xlu1 %v412_v34, 264  ;;  %414 = vbcast.lane.b32.xlu0 %v412_v34, 256 }
  0x96   : > { %429 = vbcast.lane.b32.xlu1 %v423_v35, 264  ;;  %425 = vbcast.lane.b32.xlu0 %v423_v35, 256 }
  0x9a   : > { %440 = vbcast.lane.b32.xlu1 %v434_v36, 264  ;;  %436 = vbcast.lane.b32.xlu0 %v434_v36, 256  ;;  %v599_v36 = vrot.slane %v174_v52, %v4158_v15 }
  0x9e   : > { %451 = vbcast.lane.b32.xlu1 %v445_v38, 264  ;;  %447 = vbcast.lane.b32.xlu0 %v445_v38, 256 }
  0xa2   : > { %462 = vbcast.lane.b32.xlu1 %v456_v39, 264  ;;  %458 = vbcast.lane.b32.xlu0 %v456_v39, 256 }
  0xa6   : > { %473 = vbcast.lane.b32.xlu1 %v467_v40, 264  ;;  %469 = vbcast.lane.b32.xlu0 %v467_v40, 256 }
  0xaa   : > { %484 = vbcast.lane.b32.xlu1 %v478_v41, 264  ;;  %480 = vbcast.lane.b32.xlu0 %v478_v41, 256 }
  0xae   : > { %495 = vbcast.lane.b32.xlu1 %v489_v42, 264  ;;  %491 = vbcast.lane.b32.xlu0 %v489_v42, 256  ;;  %v610_v42 = vrot.slane %v174_v52, %v4162_v17 }
  0xb0   : > { %v4190_v44 = vpop.permute.xlu1 %194  ;;  %v4192_v45 = vpop.permute.xlu0 %183 }
  0xb2   : > { %506 = vbcast.lane.b32.xlu1 %v500_v43, 264  ;;  %502 = vbcast.lane.b32.xlu0 %v500_v43, 256 }
  0xb4   : > { %v4195_v49 = vpop.permute.xlu1 %198  ;;  %v4197_v50 = vpop.permute.xlu0 %187 }
  0xb5   : > { %6431 = vst [vmem:[#allocation5_spill] sm:$0xff] %v4195_v49  ;;  %6432 = vst [vmem:[#allocation6_spill] sm:$0xff] %v4197_v50 }
  0xb6   : > { %517 = vbcast.lane.b32.xlu1 %v511_v46, 264  ;;  %513 = vbcast.lane.b32.xlu0 %v511_v46, 256 }
  0xb8   : > { %v4201_v54 = vpop.permute.xlu1 %209  ;;  %v4203_v55 = vpop.permute.xlu0 %205 }
  0xb9   : > { %6433 = vst [vmem:[#allocation7_spill] sm:$0xff] %v4201_v54  ;;  %v882_v58 = vcombine.low %v4192_v45, %v4203_v55 }
  0xba   : > { %528 = vbcast.lane.b32.xlu1 %v522_v51, 264  ;;  %524 = vbcast.lane.b32.xlu0 %v522_v51, 256 }
  0xbb   : > { %v890_v0 = vrot.slane %v882_v58, %v4207_v57 }
  0xbc   : > { %v4211_v59 = vpop.permute.xlu1 %220  ;;  %v4213_v60 = vpop.permute.xlu0 %216 }
  0xbd   : > { %6434 = vst [vmem:[#allocation8_spill] sm:$0xff] %v4211_v59  ;;  %v898_v61 = vcombine.low %v4190_v44, %v4213_v60 }
  0xbe   : > { %539 = vbcast.lane.b32.xlu1 %v533_v56, 264  ;;  %535 = vbcast.lane.b32.xlu0 %v533_v56, 256  ;;  %v621_v56 = vrot.slane %v175_v48, %v4136_v3 }
  0xbf   : > { %v906_v63 = vrot.slane %v898_v61, %v4207_v57 }
  0xc0   : > { %v4220_v4 = vpop.permute.xlu1 %231  ;;  %v4222_v5 = vpop.permute.xlu0 %227 }
  0xc1   : > { %6435 = vst [vmem:[#allocation9_spill] sm:$0xff] %v4220_v4  ;;  %v947_v6 = vcombine.high %v890_v0, %v906_v63  ;;  %v946_v30 = vcombine.low %v890_v0, %v906_v63  ;;  %v632_v63 = vrot.slane %v175_v48, %v4133_v2 }
  0xc2   : > { %550 = vbcast.lane.b32.xlu1 %v544_v62, 264  ;;  %546 = vbcast.lane.b32.xlu0 %v544_v62, 256 }
  0xc3   : > { %v4259_v1 = vrot.slane %v946_v30, %v4246_v29  ;;  %v4265_v40 = vrot.slane %v947_v6, %v4246_v29 }
  0xc4   : > { %v4225_v10 = vpop.permute.xlu1 %242  ;;  %v4227_v12 = vpop.permute.xlu0 %238 }
  0xc5   : > { %6436 = vst [vmem:[#allocation10_spill] sm:$0xff] %v4225_v10  ;;  %6443 = vst [vmem:[#allocation17_spill] sm:$0xff] %v4259_v1 }
  0xc6   : > { %561 = vbcast.lane.b32.xlu1 %v555_v8, 264  ;;  %557 = vbcast.lane.b32.xlu0 %v555_v8, 256 }
  0xc8   : > { %v4230_v19 = vpop.permute.xlu1 %253  ;;  %v4232_v20 = vpop.permute.xlu0 %249 }
  0xc9   : > { %6437 = vst [vmem:[#allocation11_spill] sm:$0xff] %v4230_v19  ;;  %v914_v23 = vcombine.low %v4222_v5, %v4232_v20 }
  0xca   : > { %572 = vbcast.lane.b32.xlu1 %v566_v14, 264  ;;  %568 = vbcast.lane.b32.xlu0 %v566_v14, 256 }
  0xcb   : > { %v922_v31 = vrot.slane %v914_v23, %v4207_v57 }
  0xcc   : > { %v4237_v24 = vpop.permute.xlu1 %264  ;;  %v4239_v25 = vpop.permute.xlu0 %260 }
  0xcd   : > { %6438 = vst [vmem:[#allocation12_spill] sm:$0xff] %v4237_v24  ;;  %v930_v26 = vcombine.low %v4227_v12, %v4239_v25 }
  0xce   : > { %583 = vbcast.lane.b32.xlu1 %v577_v21, 264  ;;  %579 = vbcast.lane.b32.xlu0 %v577_v21, 256 }
  0xcf   : > { %v938_v28 = vrot.slane %v930_v26, %v4207_v57 }
  0xd0   : > { %v4249_v32 = vpop.permute.xlu1 %275  ;;  %v4251_v33 = vpop.permute.xlu0 %271 }
  0xd1   : > { %6439 = vst [vmem:[#allocation13_spill] sm:$0xff] %v4249_v32  ;;  %6440 = vst [vmem:[#allocation14_spill] sm:$0xff] %v4251_v33  ;;  %v978_v34 = vcombine.low %v922_v31, %v938_v28  ;;  %v979_v35 = vcombine.high %v922_v31, %v938_v28 }
  0xd2   : > { %594 = vbcast.lane.b32.xlu1 %v588_v27, 264  ;;  %590 = vbcast.lane.b32.xlu0 %v588_v27, 256  ;;  %v665_v27 = vrot.slane %v175_v48, %v4150_v11 }
  0xd3   : > { %v4262_v39 = vrot.slane %v978_v34, %v4246_v29  ;;  %v4268_v41 = vrot.slane %v979_v35, %v4246_v29  ;;  %v676_v34 = vrot.slane %v175_v48, %v4154_v13 }
  0xd4   : > { %v4254_v37 = vpop.permute.xlu1 %286  ;;  %v4256_v38 = vpop.permute.xlu0 %282 }
  0xd5   : > { %6441 = vst [vmem:[#allocation15_spill] sm:$0xff] %v4254_v37  ;;  %6442 = vst [vmem:[#allocation16_spill] sm:$0xff] %v4256_v38 }
  0xd6   : > { %6444 = vst [vmem:[#allocation18_spill] sm:$0xff] %v4262_v39  ;;  %605 = vbcast.lane.b32.xlu1 %v599_v36, 264  ;;  %601 = vbcast.lane.b32.xlu0 %v599_v36, 256 }
  0xd8   : > { %v4278_v51 = vpop.permute.xlu1 %297  ;;  %v4280_v53 = vpop.permute.xlu0 %293 }
  0xd9   : > { %6445 = vst [vmem:[#allocation19_spill] sm:$0xff] %v4278_v51  ;;  %6446 = vst [vmem:[#allocation20_spill] sm:$0xff] %v4280_v53  ;;  %v1018_v52 = vcombine.low %v4251_v33, %v4280_v53 }
  0xda   : > { %616 = vbcast.lane.b32.xlu1 %v610_v42, 264  ;;  %612 = vbcast.lane.b32.xlu0 %v610_v42, 256 }
  0xdb   : > { %v1026_v6 = vrot.slane %v1018_v52, %v4207_v57 }
  0xdc   : > { %v4285_v58 = vpop.permute.xlu0 %304  ;;  %v4287_v61 = vpop.permute.xlu1 %308 }
  0xdd   : > { %6447 = vst [vmem:[#allocation21_spill] sm:$0xff] %v4285_v58  ;;  %6448 = vst [vmem:[#allocation22_spill] sm:$0xff] %v4287_v61  ;;  %v1034_v62 = vcombine.low %v4256_v38, %v4285_v58 }
  0xde   : > { %627 = vbcast.lane.b32.xlu1 %v621_v56, 264  ;;  %623 = vbcast.lane.b32.xlu0 %v621_v56, 256 }
  0xdf   : > { %v1042_v0 = vrot.slane %v1034_v62, %v4207_v57 }
  0xe0   : > { %v4294_v8 = vpop.permute.xlu0 %315  ;;  %v4297_v18 = vpop.permute.xlu1 %319 }
  0xe1   : > { %6449 = vst [vmem:[#allocation23_spill] sm:$0xff] %v4294_v8  ;;  %v1083_v14 = vcombine.high %v1026_v6, %v1042_v0  ;;  %6450 = vst [vmem:[#allocation24_spill] sm:$0xff] %v4297_v18  ;;  %v1082_v42 = vcombine.low %v1026_v6, %v1042_v0 }
  0xe2   : > { %638 = vbcast.lane.b32.xlu1 %v632_v63, 264  ;;  %634 = vbcast.lane.b32.xlu0 %v632_v63, 256 }
  0xe3   : > { %v4324_v47 = vrot.slane %v1082_v42, %v4246_v29  ;;  %v4330_v0 = vrot.slane %v1083_v14, %v4246_v29  ;;  %v176_v14 = vld [vmem:[%s4124_s23 + $0x30] sm:$0xff] }
  0xe4   : > { %v4299_v21 = vpop.permute.xlu0 %326  ;;  %v4304_v26 = vpop.permute.xlu1 %330  ;;  %v764_v51 = vrot.slane %v176_v14, %v4154_v13 }
  0xe5   : > { %6451 = vst [vmem:[#allocation25_spill] sm:$0xff] %v4299_v21  ;;  %6453 = vst [vmem:[#allocation27_spill] sm:$0xff] %v4304_v26 }
  0xe6   : > { %649 = vbcast.lane.b32.xlu1 %v643_v16, 264  ;;  %645 = vbcast.lane.b32.xlu0 %v643_v16, 256  ;;  %v687_v16 = vrot.slane %v175_v48, %v4158_v15  ;;  %6455 = vst [vmem:[#allocation29_spill] sm:$0xff] %v4324_v47 }
  0xe8   : > { %v4302_v23 = vpop.permute.xlu0 %337  ;;  %v4314_v35 = vpop.permute.xlu1 %341 }
  0xe9   : > { %6452 = vst [vmem:[#allocation26_spill] sm:$0xff] %v4302_v23  ;;  %v1050_v28 = vcombine.low %v4294_v8, %v4302_v23  ;;  %6454 = vst [vmem:[#allocation28_spill] sm:$0xff] %v4314_v35  ;;  %v742_v35 = vrot.slane %v176_v14, %v4146_v9 }
  0xea   : > { %660 = vbcast.lane.b32.xlu1 %v654_v22, 264  ;;  %656 = vbcast.lane.b32.xlu0 %v654_v22, 256 }
  0xeb   : > { %v1058_v56 = vrot.slane %v1050_v28, %v4207_v57  ;;  %v698_v28 = vrot.slane %v175_v48, %v4162_v17 }
  0xec   : > { %v4309_v30 = vpop.permute.xlu0 %348 }
  0xed   : > { %v1066_v31 = vcombine.low %v4299_v21, %v4309_v30 }
  0xee   : > { %671 = vbcast.lane.b32.xlu1 %v665_v27, 264  ;;  %667 = vbcast.lane.b32.xlu0 %v665_v27, 256  ;;  %v4335_v27 = vpop.permute.xlu1 %352 }
  0xef   : > { %v1074_v36 = vrot.slane %v1066_v31, %v4207_v57  ;;  %6457 = vst [vmem:[#allocation31_spill] sm:$0xff] %v4335_v27  ;;  %v731_v27 = vrot.slane %v176_v14, %v4142_v7 }
  0xf0   : > { %v4318_v52 = vpop.permute.xlu0 %359 }
  0xf1   : > { %v1114_v62 = vcombine.low %v1058_v56, %v1074_v36  ;;  %v1115_v63 = vcombine.high %v1058_v56, %v1074_v36 }
  0xf2   : > { %682 = vbcast.lane.b32.xlu1 %v676_v34, 264  ;;  %678 = vbcast.lane.b32.xlu0 %v676_v34, 256 }
  0xf3   : > { %v4327_v31 = vrot.slane %v1114_v62, %v4246_v29  ;;  %v4333_v6 = vrot.slane %v1115_v63, %v4246_v29  ;;  %v709_v62 = vrot.slane %v176_v14, %v4136_v3  ;;  %v4348_v63 = vpop.permute.xlu1 %363 }
  0xf4   : > { %v4321_v22 = vpop.permute.xlu0 %370  ;;  %6458 = vst [vmem:[#allocation32_spill] sm:$0xff] %v4348_v63 }
  0xf5   : > { %6456 = vst [vmem:[#allocation30_spill] sm:$0xff] %v4327_v31 }
  0xf6   : > { %693 = vbcast.lane.b32.xlu1 %v687_v16, 264  ;;  %689 = vbcast.lane.b32.xlu0 %v687_v16, 256  ;;  %v720_v16 = vrot.slane %v176_v14, %v4133_v2 }
  0xf7   : > { %v4361_v26 = vpop.permute.xlu1 %374 }
  0xf8   : > { %v4345_v56 = vpop.permute.xlu0 %381  ;;  %6459 = vst [vmem:[#allocation33_spill] sm:$0xff] %v4361_v26 }
  0xf9   : > { %v1426_v48 = vcombine.low %v4318_v52, %v4345_v56 }
  0xfa   : > { %704 = vbcast.lane.b32.xlu1 %v698_v28, 264  ;;  %700 = vbcast.lane.b32.xlu0 %v698_v28, 256 }
  0xfb   : > { %v1434_v46 = vrot.slane %v1426_v48, %v4207_v57  ;;  %v4367_v37 = vpop.permute.xlu1 %385 }
  0xfc   : > { %v4352_v34 = vpop.permute.xlu0 %392  ;;  %6460 = vst [vmem:[#allocation34_spill] sm:$0xff] %v4367_v37 }
  0xfd   : > { %v1442_v36 = vcombine.low %v4321_v22, %v4352_v34 }
  0xfe   : > { %715 = vbcast.lane.b32.xlu1 %v709_v62, 264  ;;  %711 = vbcast.lane.b32.xlu0 %v709_v62, 256  ;;  %v753_v62 = vrot.slane %v176_v14, %v4150_v11 }
  0xff   : > { %v1450_v42 = vrot.slane %v1442_v36, %v4207_v57 }
 0x100   : > { %v4359_v43 = vpop.permute.xlu0 %403 }
 0x101   : > { %v1491_v28 = vcombine.high %v1434_v46, %v1450_v42  ;;  %v1490_v26 = vcombine.low %v1434_v46, %v1450_v42 }
 0x102   : > { %726 = vbcast.lane.b32.xlu1 %v720_v16, 264  ;;  %722 = vbcast.lane.b32.xlu0 %v720_v16, 256  ;;  %v4376_v16 = vpop.permute.xlu1 %396 }
 0x103   : > { %6461 = vst [vmem:[#allocation35_spill] sm:$0xff] %v4376_v16  ;;  %v775_v16 = vrot.slane %v176_v14, %v4158_v15  ;;  %v4391_v24 = vrot.slane %v1490_v26, %v4246_v29  ;;  %v4397_v46 = vrot.slane %v1491_v28, %v4246_v29 }
 0x104   : > { %v4364_v18 = vpop.permute.xlu0 %414 }
 0x105   : > { %6465 = vst [vmem:[#allocation39_spill] sm:$0xff] %v4391_v24 }
 0x106   : > { %737 = vbcast.lane.b32.xlu1 %v731_v27, 264  ;;  %733 = vbcast.lane.b32.xlu0 %v731_v27, 256  ;;  %v4386_v54 = vpop.permute.xlu1 %407 }
 0x107   : > { %6463 = vst [vmem:[#allocation37_spill] sm:$0xff] %v4386_v54 }
 0x108   : > { %v4369_v36 = vpop.permute.xlu0 %425 }
 0x109   : > { %v1458_v48 = vcombine.low %v4359_v43, %v4369_v36 }
 0x10a   : > { %748 = vbcast.lane.b32.xlu1 %v742_v35, 264  ;;  %744 = vbcast.lane.b32.xlu0 %v742_v35, 256  ;;  %v4412_v28 = vpop.permute.xlu1 %418 }
 0x10b   : > { %v1466_v63 = vrot.slane %v1458_v48, %v4207_v57  ;;  %6468 = vst [vmem:[#allocation42_spill] sm:$0xff] %v4412_v28 }
 0x10c   : > { %v4374_v61 = vpop.permute.xlu0 %436 }
 0x10d   : > { %v1474_v32 = vcombine.low %v4364_v18, %v4374_v61 }
 0x10e   : > { %759 = vbcast.lane.b32.xlu1 %v753_v62, 264  ;;  %755 = vbcast.lane.b32.xlu0 %v753_v62, 256  ;;  %v4422_v26 = vpop.permute.xlu1 %429 }
 0x10f   : > { %v1482_v27 = vrot.slane %v1474_v32, %v4207_v57  ;;  %6470 = vst [vmem:[#allocation44_spill] sm:$0xff] %v4422_v26 }
 0x110   : > { %v4383_v35 = vpop.permute.xlu0 %447 }
 0x111   : > { %6462 = vst [vmem:[#allocation36_spill] sm:$0xff] %v4383_v35  ;;  %v1522_v37 = vcombine.low %v1466_v63, %v1482_v27  ;;  %v1523_v50 = vcombine.high %v1466_v63, %v1482_v27  ;;  %v786_v63 = vrot.slane %v176_v14, %v4162_v17 }
 0x112   : > { %770 = vbcast.lane.b32.xlu1 %v764_v51, 264  ;;  %766 = vbcast.lane.b32.xlu0 %v764_v51, 256  ;;  %v4431_v19 = vpop.permute.xlu1 %440 }
 0x113   : > { %v4394_v32 = vrot.slane %v1522_v37, %v4246_v29  ;;  %v4400_v42 = vrot.slane %v1523_v50, %v4246_v29  ;;  %v177_v37 = vld [vmem:[%s4124_s23 + $0x38] sm:$0xff]  ;;  %6473 = vst [vmem:[#allocation47_spill] sm:$0xff] %v4431_v19 }
 0x114   : > { %v4388_v10 = vpop.permute.xlu0 %458  ;;  %v797_v50 = vrot.slane %v177_v37, %v4136_v3  ;;  %v819_v54 = vrot.slane %v177_v37, %v4142_v7 }
 0x115   : > { %6464 = vst [vmem:[#allocation38_spill] sm:$0xff] %v4388_v10  ;;  %6466 = vst [vmem:[#allocation40_spill] sm:$0xff] %v4394_v32 }
 0x116   : > { %781 = vbcast.lane.b32.xlu1 %v775_v16, 264  ;;  %777 = vbcast.lane.b32.xlu0 %v775_v16, 256  ;;  %v808_v16 = vrot.slane %v177_v37, %v4133_v2  ;;  %v830_v2 = vrot.slane %v177_v37, %v4146_v9  ;;  %v852_v9 = vrot.slane %v177_v37, %v4154_v13 }
 0x118   : > { %v4410_v48 = vpop.permute.xlu0 %469 }
 0x119   : > { %6467 = vst [vmem:[#allocation41_spill] sm:$0xff] %v4410_v48  ;;  %v1562_v14 = vcombine.low %v4383_v35, %v4410_v48  ;;  %v863_v35 = vrot.slane %v177_v37, %v4158_v15 }
 0x11a   : > { %792 = vbcast.lane.b32.xlu1 %v786_v63, 264  ;;  %788 = vbcast.lane.b32.xlu0 %v786_v63, 256 }
 0x11b   : > { %v1570_v28 = vrot.slane %v1562_v14, %v4207_v57 }
 0x11c   : > { %v4417_v27 = vpop.permute.xlu0 %480 }
 0x11d   : > { %6469 = vst [vmem:[#allocation43_spill] sm:$0xff] %v4417_v27  ;;  %v1578_v62 = vcombine.low %v4388_v10, %v4417_v27 }
 0x11e   : > { %803 = vbcast.lane.b32.xlu1 %v797_v50, 264  ;;  %799 = vbcast.lane.b32.xlu0 %v797_v50, 256  ;;  %v4437_v50 = vpop.permute.xlu1 %451 }
 0x11f   : > { %v1586_v51 = vrot.slane %v1578_v62, %v4207_v57  ;;  %v841_v62 = vrot.slane %v177_v37, %v4150_v11  ;;  %6475 = vst [vmem:[#allocation49_spill] sm:$0xff] %v4437_v50 }
 0x120   : > { %v4426_v3 = vpop.permute.xlu0 %491 }
 0x121   : > { %6471 = vst [vmem:[#allocation45_spill] sm:$0xff] %v4426_v3  ;;  %v1627_v63 = vcombine.high %v1570_v28, %v1586_v51  ;;  %v1626_v19 = vcombine.low %v1570_v28, %v1586_v51 }
 0x122   : > { %814 = vbcast.lane.b32.xlu1 %v808_v16, 264  ;;  %810 = vbcast.lane.b32.xlu0 %v808_v16, 256 }
 0x123   : > { %v4454_v48 = vrot.slane %v1626_v19, %v4246_v29  ;;  %v4460_v51 = vrot.slane %v1627_v63, %v4246_v29  ;;  %v1555_v19 = vcombine.high %v4391_v24, %v4394_v32 }
 0x124   : > { %v4429_v4 = vpop.permute.xlu0 %502 }
 0x125   : > { %6472 = vst [vmem:[#allocation46_spill] sm:$0xff] %v4429_v4  ;;  %6478 = vst [vmem:[#allocation52_spill] sm:$0xff] %v4454_v48 }
 0x126   : > { %825 = vbcast.lane.b32.xlu1 %v819_v54, 264  ;;  %821 = vbcast.lane.b32.xlu0 %v819_v54, 256 }
 0x128   : > { %v4434_v26 = vpop.permute.xlu0 %513 }
 0x129   : > { %6474 = vst [vmem:[#allocation48_spill] sm:$0xff] %v4434_v26  ;;  %v1594_v7 = vcombine.low %v4426_v3, %v4434_v26 }
 0x12a   : > { %836 = vbcast.lane.b32.xlu1 %v830_v2, 264  ;;  %832 = vbcast.lane.b32.xlu0 %v830_v2, 256  ;;  %v4450_v2 = vpop.permute.xlu1 %462 }
 0x12b   : > { %v1602_v11 = vrot.slane %v1594_v7, %v4207_v57  ;;  %6477 = vst [vmem:[#allocation51_spill] sm:$0xff] %v4450_v2  ;;  %v874_v7 = vrot.slane %v177_v37, %v4162_v17  ;;  %v1147_v17 = vcombine.high %v4324_v47, %v4327_v31 }
 0x12c   : > { %v4441_v14 = vpop.permute.xlu0 %524 }
 0x12d   : > { %6476 = vst [vmem:[#allocation50_spill] sm:$0xff] %v4441_v14  ;;  %v1610_v16 = vcombine.low %v4429_v4, %v4441_v14 }
 0x12e   : > { %847 = vbcast.lane.b32.xlu1 %v841_v62, 264  ;;  %843 = vbcast.lane.b32.xlu0 %v841_v62, 256 }
 0x12f   : > { %v1618_v54 = vrot.slane %v1610_v16, %v4207_v57  ;;  %v4474_v16 = vpop.permute.xlu1 %473 }
 0x130   : > { %v4448_v49 = vpop.permute.xlu0 %535  ;;  %6480 = vst [vmem:[#allocation54_spill] sm:$0xff] %v4474_v16 }
 0x131   : > { %v1658_v50 = vcombine.low %v1602_v11, %v1618_v54  ;;  %v1659_v59 = vcombine.high %v1602_v11, %v1618_v54  ;;  %v1011_v54 = vcombine.high %v4259_v1, %v4262_v39 }
 0x132   : > { %858 = vbcast.lane.b32.xlu1 %v852_v9, 264  ;;  %854 = vbcast.lane.b32.xlu0 %v852_v9, 256 }
 0x133   : > { %v4457_v13 = vrot.slane %v1658_v50, %v4246_v29  ;;  %v4463_v28 = vrot.slane %v1659_v59, %v4246_v29  ;;  %v4482_v37 = vpop.permute.xlu1 %484 }
 0x134   : > { %v4465_v62 = vpop.permute.xlu0 %546  ;;  %6481 = vst [vmem:[#allocation55_spill] sm:$0xff] %v4482_v37 }
 0x135   : > { %6479 = vst [vmem:[#allocation53_spill] sm:$0xff] %v4457_v13  ;;  %v1691_v15 = vcombine.high %v4454_v48, %v4457_v13 }
 0x136   : > { %869 = vbcast.lane.b32.xlu1 %v863_v35, 264  ;;  %865 = vbcast.lane.b32.xlu0 %v863_v35, 256 }
 0x137   : > { %v4501_v47 = vpop.permute.xlu1 %495 }
 0x138   : > { %v4476_v63 = vpop.permute.xlu0 %557  ;;  %6482 = vst [vmem:[#allocation56_spill] sm:$0xff] %v4501_v47 }
 0x139   : > { %v1970_v59 = vcombine.low %v4448_v49, %v4476_v63 }
 0x13a   : > { %880 = vbcast.lane.b32.xlu1 %v874_v7, 264  ;;  %876 = vbcast.lane.b32.xlu0 %v874_v7, 256 }
 0x13b   : > { %v1978_v11 = vrot.slane %v1970_v59, %v4207_v57  ;;  %v4506_v59 = vpop.permute.xlu1 %506 }
 0x13c   : > { %v4484_v9 = vpop.permute.xlu0 %568  ;;  %6483 = vst [vmem:[#allocation57_spill] sm:$0xff] %v4506_v59 }
 0x13d   : > { %v1986_v35 = vcombine.low %v4465_v62, %v4484_v9 }
 0x13e   : > { %3068 = vrot.lane.b32.xlu1 %v1147_v17, %s4001_s17  ;;  %3066 = vrot.lane.b32.xlu0 %v1011_v54, %s4001_s17 }
 0x13f   : > { %v1994_v7 = vrot.slane %v1986_v35, %v4207_v57  ;;  %v4516_v32 = vpop.permute.xlu1 %517 }
 0x140   : > { %v4496_v50 = vpop.permute.xlu0 %579  ;;  %6484 = vst [vmem:[#allocation58_spill] sm:$0xff] %v4516_v32 }
 0x141   : > { %v2035_v31 = vcombine.high %v1978_v11, %v1994_v7 }
 0x142   : > { %3072 = vrot.lane.b32.xlu1 %v1691_v15, %s4001_s17  ;;  %3070 = vrot.lane.b32.xlu0 %v1555_v19, %s4001_s17  ;;  %v2034_v15 = vcombine.low %v1978_v11, %v1994_v7 }
 0x143   : > { %v4529_v37 = vrot.slane %v2035_v31, %v4246_v29  ;;  %v4534_v11 = vpop.permute.xlu1 %528 }
 0x144   : > { %v4504_v17 = vpop.permute.xlu0 %590  ;;  %v4523_v47 = vrot.slane %v2034_v15, %v4246_v29  ;;  %6488 = vst [vmem:[#allocation62_spill] sm:$0xff] %v4534_v11 }
 0x146   : > { %6486 = vst [vmem:[#allocation60_spill] sm:$0xff] %v4523_v47 }
 0x148   : > { %v4508_v54 = vpop.permute.xlu0 %601 }
 0x149   : > { %v2002_v35 = vcombine.low %v4496_v50, %v4508_v54 }
 0x14b   : > { %v2010_v24 = vrot.slane %v2002_v35, %v4207_v57  ;;  %v4549_v35 = vpop.permute.xlu1 %539 }
 0x14c   : > { %v4512_v13 = vpop.permute.xlu0 %612  ;;  %6491 = vst [vmem:[#allocation65_spill] sm:$0xff] %v4549_v35 }
 0x14d   : > { %v2018_v48 = vcombine.low %v4504_v17, %v4512_v13 }
 0x14f   : > { %v2026_v19 = vrot.slane %v2018_v48, %v4207_v57  ;;  %v4559_v16 = vpop.permute.xlu1 %550 }
 0x150   : > { %v4520_v39 = vpop.permute.xlu0 %623  ;;  %6493 = vst [vmem:[#allocation67_spill] sm:$0xff] %v4559_v16 }
 0x151   : > { %6485 = vst [vmem:[#allocation59_spill] sm:$0xff] %v4520_v39  ;;  %v2066_v1 = vcombine.low %v2010_v24, %v2026_v19  ;;  %v2067_v59 = vcombine.high %v2010_v24, %v2026_v19 }
 0x153   : > { %v4526_v2 = vrot.slane %v2066_v1, %v4246_v29  ;;  %v4532_v32 = vrot.slane %v2067_v59, %v4246_v29 }
 0x154   : > { %v4536_v7 = vpop.permute.xlu0 %634 }
 0x155   : > { %6487 = vst [vmem:[#allocation61_spill] sm:$0xff] %v4526_v2  ;;  %6489 = vst [vmem:[#allocation63_spill] sm:$0xff] %v4536_v7  ;;  %v2099_v48 = vcombine.high %v4523_v47, %v4526_v2  ;;  %v4565_v47 = vpop.permute.xlu1 %561 }
 0x156   : > { %6496 = vst [vmem:[#allocation70_spill] sm:$0xff] %v4565_v47 }
 0x157   : > { %3074 = vrot.lane.b32.xlu0 %v2099_v48, %s4001_s17 }
 0x158   : > { %v4547_v59 = vpop.permute.xlu0 %645 }
 0x159   : > { %6490 = vst [vmem:[#allocation64_spill] sm:$0xff] %v4547_v59  ;;  %v2106_v15 = vcombine.low %v4520_v39, %v4547_v59  ;;  %v4571_v59 = vpop.permute.xlu1 %572 }
 0x15a   : > { %6498 = vst [vmem:[#allocation72_spill] sm:$0xff] %v4571_v59 }
 0x15b   : > { %v2114_v11 = vrot.slane %v2106_v15, %v4207_v57 }
 0x15c   : > { %v4553_v19 = vpop.permute.xlu0 %656 }
 0x15d   : > { %6492 = vst [vmem:[#allocation66_spill] sm:$0xff] %v4553_v19  ;;  %v2122_v24 = vcombine.low %v4536_v7, %v4553_v19  ;;  %v4581_v10 = vpop.permute.xlu1 %583 }
 0x15e   : > { %6500 = vst [vmem:[#allocation74_spill] sm:$0xff] %v4581_v10 }
 0x15f   : > { %v2130_v1 = vrot.slane %v2122_v24, %v4207_v57 }
 0x160   : > { %v4561_v31 = vpop.permute.xlu0 %667 }
 0x161   : > { %6494 = vst [vmem:[#allocation68_spill] sm:$0xff] %v4561_v31  ;;  %v2171_v48 = vcombine.high %v2114_v11, %v2130_v1  ;;  %v2170_v15 = vcombine.low %v2114_v11, %v2130_v1 }
 0x164   : > { %v4563_v2 = vpop.permute.xlu0 %678 }
 0x165   : > { %6495 = vst [vmem:[#allocation69_spill] sm:$0xff] %v4563_v2 }
 0x168   : > { %v4567_v35 = vpop.permute.xlu0 %689 }
 0x169   : > { %6497 = vst [vmem:[#allocation71_spill] sm:$0xff] %v4567_v35  ;;  %v2138_v39 = vcombine.low %v4561_v31, %v4567_v35  ;;  %v4584_v31 = vrot.slane %v2170_v15, %v4246_v29  ;;  %v4590_v35 = vrot.slane %v2171_v48, %v4246_v29  ;;  %v4606_v48 = vpop.permute.xlu1 %594 }
 0x16a   : > { %6503 = vst [vmem:[#allocation77_spill] sm:$0xff] %v4606_v48 }
 0x16b   : > { %v2146_v16 = vrot.slane %v2138_v39, %v4207_v57  ;;  %6501 = vst [vmem:[#allocation75_spill] sm:$0xff] %v4584_v31 }
 0x16c   : > { %v4573_v7 = vpop.permute.xlu0 %700 }
 0x16d   : > { %6499 = vst [vmem:[#allocation73_spill] sm:$0xff] %v4573_v7  ;;  %v2154_v24 = vcombine.low %v4563_v2, %v4573_v7  ;;  %v4612_v15 = vpop.permute.xlu1 %605 }
 0x16e   : > { %6504 = vst [vmem:[#allocation78_spill] sm:$0xff] %v4612_v15 }
 0x16f   : > { %v2162_v19 = vrot.slane %v2154_v24, %v4207_v57 }
 0x170   : > { %v4579_v3 = vpop.permute.xlu0 %711 }
 0x171   : > { %v2202_v47 = vcombine.low %v2146_v16, %v2162_v19  ;;  %v2203_v26 = vcombine.high %v2146_v16, %v2162_v19  ;;  %v4616_v2 = vpop.permute.xlu1 %616 }
 0x172   : > { %6505 = vst [vmem:[#allocation79_spill] sm:$0xff] %v4616_v2 }
 0x173   : > { %v4587_v59 = vrot.slane %v2202_v47, %v4246_v29  ;;  %v4593_v11 = vrot.slane %v2203_v26, %v4246_v29 }
 0x174   : > { %v4595_v39 = vpop.permute.xlu0 %722 }
 0x175   : > { %6502 = vst [vmem:[#allocation76_spill] sm:$0xff] %v4587_v59  ;;  %v2235_v1 = vcombine.high %v4584_v31, %v4587_v59  ;;  %v4626_v59 = vpop.permute.xlu1 %627 }
 0x176   : > { %6506 = vst [vmem:[#allocation80_spill] sm:$0xff] %v4626_v59 }
 0x177   : > { %3076 = vrot.lane.b32.xlu1 %v2235_v1, %s4001_s17 }
 0x178   : > { %v4608_v26 = vpop.permute.xlu0 %733 }
 0x179   : > { %v2514_v1 = vcombine.low %v4579_v3, %v4608_v26  ;;  %v4638_v33 = vpop.permute.xlu1 %638 }
 0x17a   : > { %6507 = vst [vmem:[#allocation81_spill] sm:$0xff] %v4638_v33 }
 0x17b   : > { %v2522_v2 = vrot.slane %v2514_v1, %v4207_v57 }
 0x17c   : > { %v4610_v24 = vpop.permute.xlu0 %744 }
 0x17d   : > { %v2530_v19 = vcombine.low %v4595_v39, %v4610_v24  ;;  %v4652_v8 = vpop.permute.xlu1 %649 }
 0x17e   : > { %6510 = vst [vmem:[#allocation84_spill] sm:$0xff] %v4652_v8  ;;  %v883_v8 = vcombine.high %v4192_v45, %v4203_v55 }
 0x17f   : > { %v2538_v31 = vrot.slane %v2530_v19, %v4207_v57 }
 0x180   : > { %v4614_v10 = vpop.permute.xlu0 %755 }
 0x181   : > { %v2578_v27 = vcombine.low %v2522_v2, %v2538_v31  ;;  %v2579_v21 = vcombine.high %v2522_v2, %v2538_v31 }
 0x183   : > { %v4643_v53 = vrot.slane %v2578_v27, %v4246_v29  ;;  %v6511_v27 = vcombine.low %v4265_v40, %v4268_v41 }
 0x184   : > { %v4618_v16 = vpop.permute.xlu0 %766 }
 0x185   : > { %6508 = vst [vmem:[#allocation82_spill] sm:$0xff] %v4643_v53 }
 0x188   : > { %v4622_v47 = vpop.permute.xlu0 %777 }
 0x189   : > { %v2546_v48 = vcombine.low %v4614_v10, %v4622_v47 }
 0x18b   : > { %v2554_v4 = vrot.slane %v2546_v48, %v4207_v57 }
 0x18c   : > { %v4631_v15 = vpop.permute.xlu0 %788 }
 0x18d   : > { %v2562_v7 = vcombine.low %v4618_v16, %v4631_v15 }
 0x18f   : > { %v2570_v14 = vrot.slane %v2562_v7, %v4207_v57  ;;  %v6513_v7 = vcombine.low %v4397_v46, %v4400_v42 }
 0x190   : > { %v4640_v59 = vpop.permute.xlu0 %799 }
 0x191   : > { %v2610_v19 = vcombine.low %v2554_v4, %v2570_v14  ;;  %v2611_v23 = vcombine.high %v2554_v4, %v2570_v14 }
 0x193   : > { %v4646_v38 = vrot.slane %v2610_v19, %v4246_v29  ;;  %v4663_v19 = vpop.permute.xlu1 %660 }
 0x194   : > { %v4648_v1 = vpop.permute.xlu0 %810  ;;  %6512 = vst [vmem:[#allocation85_spill] sm:$0xff] %v4663_v19  ;;  %v2593_v19 = vrot.slane %v2579_v21, %v4246_v29 }
 0x195   : > { %6509 = vst [vmem:[#allocation83_spill] sm:$0xff] %v4646_v38  ;;  %v2643_v58 = vcombine.high %v4643_v53, %v4646_v38  ;;  %v2625_v38 = vrot.slane %v2611_v23, %v4246_v29  ;;  %v931_v23 = vcombine.high %v4227_v12, %v4239_v25 }
 0x197   : > { %3078 = vrot.lane.b32.xlu0 %v2643_v58, %s4001_s17  ;;  %v4674_v53 = vpop.permute.xlu1 %671  ;;  %v2644_v14 = vcombine.low %v2593_v19, %v2625_v38 }
 0x198   : > { %v4657_v48 = vpop.permute.xlu0 %821  ;;  %6514 = vst [vmem:[#allocation86_spill] sm:$0xff] %v4674_v53  ;;  %v915_v53 = vcombine.high %v4222_v5, %v4232_v20  ;;  %v1475_v5 = vcombine.high %v4364_v18, %v4374_v61  ;;  %v1459_v61 = vcombine.high %v4359_v43, %v4369_v36  ;;  %v2019_v36 = vcombine.high %v4504_v17, %v4512_v13 }
 0x199   : > { %v2650_v21 = vcombine.low %v4640_v59, %v4657_v48 }
 0x19b   : > { %3098 = vrot.lane.b32.xlu0 %v6511_v27, %s4002_s24  ;;  %v6515_v27 = vcombine.low %v4529_v37, %v4532_v32  ;;  %v4688_v31 = vpop.permute.xlu1 %682  ;;  %v4720_v55 = vrot.slane %v2650_v21, %v4207_v57 }
 0x19c   : > { %v4665_v33 = vpop.permute.xlu0 %832  ;;  %6516 = vst [vmem:[#allocation87_spill] sm:$0xff] %v4688_v31 }
 0x19d   : > { %v2666_v2 = vcombine.low %v4648_v1, %v4665_v33 }
 0x19f   : > { %3102 = vrot.lane.b32.xlu0 %v6513_v7, %s4002_s24  ;;  %v4731_v18 = vpop.permute.xlu1 %693 }
 0x1a0   : > { %v4671_v58 = vpop.permute.xlu0 %843  ;;  %6518 = vst [vmem:[#allocation88_spill] sm:$0xff] %v4731_v18 }
 0x1a3   : > { %3106 = vrot.lane.b32.xlu0 %v6515_v27, %s4002_s24  ;;  %v899_v27 = vcombine.high %v4190_v44, %v4213_v60  ;;  %v6517_v44 = vcombine.high %v4265_v40, %v4268_v41  ;;  %v4710_v60 = vrot.slane %v931_v23, %v4207_v57  ;;  %v4725_v40 = vrot.slane %v915_v53, %v4207_v57 }
 0x1a4   : > { %v4681_v4 = vpop.permute.xlu0 %854  ;;  %v1443_v41 = vcombine.high %v4321_v22, %v4352_v34  ;;  %v6519_v53 = vcombine.high %v4397_v46, %v4400_v42  ;;  %v1427_v22 = vcombine.high %v4318_v52, %v4345_v56  ;;  %v4759_v46 = vrot.slane %v1459_v61, %v4207_v57 }
 0x1a5   : > { %v4717_v45 = vrot.slane %v899_v27, %v4207_v57  ;;  %v994_v43 = vcombine.low %v4725_v40, %v4710_v60  ;;  %v1987_v42 = vcombine.high %v4465_v62, %v4484_v9  ;;  %v2003_v52 = vcombine.high %v4496_v50, %v4508_v54  ;;  %v4782_v9 = vpop.permute.xlu1 %704 }
 0x1a6   : > { %v6520_v56 = vcombine.high %v4529_v37, %v4532_v32  ;;  %v1971_v50 = vcombine.high %v4448_v49, %v4476_v63  ;;  %6523 = vst [vmem:[#allocation91_spill] sm:$0xff] %v4782_v9  ;;  %v4786_v37 = vrot.slane %v2019_v36, %v4207_v57  ;;  %v2563_v54 = vcombine.high %v4618_v16, %v4631_v15 }
 0x1a7   : > { %3110 = vrot.lane.b32.xlu0 %v2644_v14, %s4002_s24  ;;  %v4701_v14 = vrot.slane %v2666_v2, %v4207_v57  ;;  %v4734_v2 = vrot.slane %v883_v8, %v4207_v57  ;;  %v4749_v8 = vrot.slane %v1475_v5, %v4207_v57  ;;  %v4776_v5 = vrot.slane %v1427_v22, %v4207_v57 }
 0x1a8   : > { %v4690_v7 = vpop.permute.xlu0 %865  ;;  %v1002_v32 = vrot.slane %v994_v43, %v4246_v29  ;;  %v4798_v49 = vrot.slane %v2003_v52, %v4207_v57  ;;  %v4811_v43 = vrot.slane %v1971_v50, %v4207_v57 }
 0x1a9   : > { %v2682_v12 = vcombine.low %v4671_v58, %v4690_v7  ;;  %v2714_v23 = vcombine.low %v4720_v55, %v4701_v14  ;;  %v962_v34 = vcombine.low %v4734_v2, %v4717_v45  ;;  %v1538_v62 = vcombine.low %v4759_v46, %v4749_v8 }
 0x1aa   : > { %v2082_v22 = vcombine.low %v4798_v49, %v4786_v37 }
 0x1ab   : > { %3130 = vrot.lane.b32.xlu0 %v6517_v44, %s4003_s25  ;;  %v2690_v27 = vrot.slane %v2682_v12, %v4207_v57  ;;  %v4756_v44 = vrot.slane %v1443_v41, %v4207_v57  ;;  %v4770_v13 = vrot.slane %v2714_v23, %v4246_v29  ;;  %v4795_v23 = vrot.slane %v1987_v42, %v4207_v57 }
 0x1ac   : > { %v4714_v20 = vpop.permute.xlu0 %876  ;;  %v970_v63 = vrot.slane %v962_v34, %v4246_v29 }
 0x1ad   : > { %v2698_v25 = vcombine.low %v4681_v4, %v4714_v20  ;;  %6521 = vst [vmem:[#allocation89_spill] sm:$0xff] %v4770_v13  ;;  %v1506_v61 = vcombine.low %v4776_v5, %v4756_v44  ;;  %v2050_v34 = vcombine.low %v4811_v43, %v4795_v23 }
 0x1ae   : > { %v1014_v15 = vcombine.low %v970_v63, %v1002_v32 }
 0x1af   : > { %v2706_v21 = vrot.slane %v2698_v25, %v4207_v57  ;;  %3134 = vrot.lane.b32.xlu0 %v6519_v53, %s4003_s25  ;;  %v2645_v25 = vcombine.high %v2593_v19, %v2625_v38  ;;  %v2531_v53 = vcombine.high %v4595_v39, %v4610_v24  ;;  %v2547_v38 = vcombine.high %v4614_v10, %v4622_v47  ;;  %v4820_v47 = vpop.permute.xlu1 %715 }
 0x1b0   : > { %v1546_v19 = vrot.slane %v1538_v62, %v4246_v29  ;;  %v2515_v39 = vcombine.high %v4579_v3, %v4608_v26  ;;  %v4818_v10 = vrot.slane %v2563_v54, %v4207_v57  ;;  %6524 = vst [vmem:[#allocation92_spill] sm:$0xff] %v4820_v47  ;;  %v1514_v24 = vrot.slane %v1506_v61, %v4246_v29 }
 0x1b1   : > { %v2746_v12 = vcombine.low %v2690_v27, %v2706_v21  ;;  %v4826_v36 = vrot.slane %v2531_v53, %v4207_v57  ;;  %v6525_v3 = vcombine.low %v4330_v0, %v4333_v6  ;;  %v2090_v62 = vrot.slane %v2082_v22, %v4246_v29 }
 0x1b2   : > { %v1558_v26 = vcombine.low %v1514_v24, %v1546_v19  ;;  %v4837_v42 = vrot.slane %v2515_v39, %v4207_v57  ;;  %v2715_v54 = vcombine.high %v4720_v55, %v4701_v14  ;;  %v6528_v14 = vcombine.low %v4590_v35, %v4593_v11 }
 0x1b3   : > { %3138 = vrot.lane.b32.xlu0 %v6520_v56, %s4003_s25  ;;  %v4773_v17 = vrot.slane %v2746_v12, %v4246_v29  ;;  %v4829_v12 = vrot.slane %v2547_v38, %v4207_v57  ;;  %v2747_v56 = vcombine.high %v2690_v27, %v2706_v21  ;;  %v4852_v61 = vpop.permute.xlu1 %726 }
 0x1b4   : > { %v2594_v50 = vcombine.low %v4837_v42, %v4826_v36  ;;  %6527 = vst [vmem:[#allocation93_spill] sm:$0xff] %v4852_v61  ;;  %v2729_v38 = vrot.slane %v2715_v54, %v4246_v29 }
 0x1b5   : > { %6522 = vst [vmem:[#allocation90_spill] sm:$0xff] %v4773_v17  ;;  %v2779_v41 = vcombine.high %v4770_v13, %v4773_v17  ;;  %v2626_v52 = vcombine.low %v4829_v12, %v4818_v10  ;;  %v4858_v53 = vrot.slane %v2747_v56, %v4246_v29 }
 0x1b6   : > { %v2602_v55 = vrot.slane %v2594_v50, %v4246_v29  ;;  %v6533_v50 = vld [vmem:[#allocation21_spill] sm:$0xff] }
 0x1b7   : > { %3142 = vrot.lane.b32.xlu0 %v2645_v25, %s4003_s25  ;;  %3080 = vrot.lane.b32.xlu1 %v2779_v41, %s4001_s17  ;;  %v6526_v25 = vcombine.low %v4460_v51, %v4463_v28  ;;  %v2058_v41 = vrot.slane %v2050_v34, %v4246_v29  ;;  %v4855_v21 = vrot.slane %v2626_v52, %v4246_v29  ;;  %v4869_v39 = vpop.permute.xlu1 %737  ;;  %v6530_v34 = vld [vmem:[#allocation25_spill] sm:$0xff]  ;;  %v6532_v52 = vld [vmem:[#allocation23_spill] sm:$0xff] }
 0x1b8   : > { %v2780_v22 = vcombine.low %v2729_v38, %v4858_v53  ;;  %6529 = vst [vmem:[#allocation94_spill] sm:$0xff] %v4869_v39 }
 0x1b9   : > { %v2102_v27 = vcombine.low %v2058_v41, %v2090_v62 }
 0x1bb   : > { %3162 = vrot.lane.b32.xlu0 %v1014_v15, %s4004_s26  ;;  %3100 = vrot.lane.b32.xlu1 %v6525_v3, %s4002_s24  ;;  %v2646_v15 = vcombine.low %v2602_v55, %v4855_v21  ;;  %v1067_v3 = vcombine.high %v6530_v34, %v4309_v30  ;;  %v6535_v30 = vcombine.high %v4330_v0, %v4333_v6  ;;  %v6539_v34 = vld [vmem:[#allocation46_spill] sm:$0xff]  ;;  %v6541_v0 = vld [vmem:[#allocation43_spill] sm:$0xff] }
 0x1bc   : > { %v6542_v6 = vld [vmem:[#allocation38_spill] sm:$0xff] }
 0x1bd   : > { %v4882_v16 = vrot.slane %v1067_v3, %v4207_v57  ;;  %v1559_v3 = vcombine.high %v1514_v24, %v1546_v19  ;;  %v6546_v24 = vld [vmem:[#allocation41_spill] sm:$0xff] }
 0x1bf   : > { %3166 = vrot.lane.b32.xlu0 %v1558_v26, %s4004_s26  ;;  %3104 = vrot.lane.b32.xlu1 %v6526_v25, %s4002_s24  ;;  %v6531_v26 = vld [vmem:[#allocation26_spill] sm:$0xff]  ;;  %v1015_v25 = vcombine.high %v970_v63, %v1002_v32 }
 0x1c0   : > { %v1051_v56 = vcombine.high %v6532_v52, %v6531_v26  ;;  %v6538_v63 = vld [vmem:[#allocation50_spill] sm:$0xff]  ;;  %v4893_v52 = vpop.permute.xlu1 %748 }
 0x1c1   : > { %v1611_v26 = vcombine.high %v6539_v34, %v6538_v63  ;;  %6540 = vst [vmem:[#allocation25_spill] sm:$0xff] %v4893_v52  ;;  %v6548_v34 = vld [vmem:[#allocation73_spill] sm:$0xff] }
 0x1c3   : > { %3170 = vrot.lane.b32.xlu0 %v2102_v27, %s4004_s26  ;;  %3108 = vrot.lane.b32.xlu1 %v6528_v14, %s4002_s24  ;;  %v6534_v27 = vld [vmem:[#allocation16_spill] sm:$0xff]  ;;  %v995_v14 = vcombine.high %v4725_v40, %v4710_v60  ;;  %v963_v60 = vcombine.high %v4734_v2, %v4717_v45  ;;  %v4898_v40 = vrot.slane %v1051_v56, %v4207_v57 }
 0x1c4   : > { %v1035_v54 = vcombine.high %v6534_v27, %v6533_v50  ;;  %v1579_v50 = vcombine.high %v6542_v6, %v6541_v0  ;;  %v6543_v27 = vld [vmem:[#allocation48_spill] sm:$0xff]  ;;  %v6545_v45 = vcombine.high %v4460_v51, %v4463_v28  ;;  %v4923_v63 = vrot.slane %v1611_v26, %v4207_v57  ;;  %v6549_v0 = vld [vmem:[#allocation69_spill] sm:$0xff] }
 0x1c5   : > { %v4915_v2 = vrot.slane %v995_v14, %v4246_v29  ;;  %v6547_v56 = vld [vmem:[#allocation36_spill] sm:$0xff]  ;;  %v2103_v6 = vcombine.high %v2058_v41, %v2090_v62  ;;  %v6555_v41 = vcombine.high %v4590_v35, %v4593_v11  ;;  %v2699_v11 = vcombine.high %v4681_v4, %v4714_v20 }
 0x1c6   : > { %v4933_v28 = vrot.slane %v1579_v50, %v4207_v57  ;;  %v2667_v4 = vcombine.high %v4648_v1, %v4665_v33  ;;  %v2683_v20 = vcombine.high %v4671_v58, %v4690_v7  ;;  %v2651_v7 = vcombine.high %v4640_v59, %v4657_v48 }
 0x1c7   : > { %3174 = vrot.lane.b32.xlu0 %v2646_v15, %s4004_s26  ;;  %3112 = vrot.lane.b32.xlu1 %v2780_v22, %s4002_s24  ;;  %v6536_v15 = vld [vmem:[#allocation20_spill] sm:$0xff]  ;;  %v6537_v22 = vld [vmem:[#allocation14_spill] sm:$0xff] }
 0x1c8   : > { %v1019_v32 = vcombine.high %v6537_v22, %v6536_v15  ;;  %v1130_v22 = vcombine.low %v4898_v40, %v4882_v16  ;;  %v5025_v59 = vrot.slane %v2683_v20, %v4207_v57  ;;  %v6562_v20 = vld [vmem:[#allocation11_spill] sm:$0xff] }
 0x1ca   : > { %v4918_v19 = vrot.slane %v1019_v32, %v4207_v57  ;;  %v6550_v32 = vld [vmem:[#allocation66_spill] sm:$0xff]  ;;  %v4952_v50 = vrot.slane %v1130_v22, %v4246_v29  ;;  %v2647_v22 = vcombine.high %v2602_v55, %v4855_v21 }
 0x1cb   : > { %3194 = vrot.lane.b32.xlu0 %v1015_v25, %s4005_s27  ;;  %3132 = vrot.lane.b32.xlu1 %v6535_v30, %s4003_s25  ;;  %v4901_v25 = vrot.slane %v1035_v54, %v4207_v57  ;;  %v6544_v30 = vld [vmem:[#allocation45_spill] sm:$0xff]  ;;  %v1563_v54 = vcombine.high %v6547_v56, %v6546_v24  ;;  %v6553_v24 = vld [vmem:[#allocation71_spill] sm:$0xff]  ;;  %v6554_v56 = vld [vmem:[#allocation68_spill] sm:$0xff] }
 0x1cc   : > { %v1595_v15 = vcombine.high %v6544_v30, %v6543_v27  ;;  %v4928_v27 = vrot.slane %v963_v60, %v4246_v29  ;;  %v6551_v30 = vld [vmem:[#allocation63_spill] sm:$0xff]  ;;  %v2139_v62 = vcombine.high %v6554_v56, %v6553_v24  ;;  %v2781_v24 = vcombine.high %v2729_v38, %v4858_v53 }
 0x1cd   : > { %v1098_v51 = vcombine.low %v4918_v19, %v4901_v25  ;;  %v2123_v26 = vcombine.high %v6551_v30, %v6550_v32  ;;  %v6557_v32 = vld [vmem:[#allocation59_spill] sm:$0xff] }
 0x1ce   : > { %v4936_v14 = vrot.slane %v1595_v15, %v4207_v57  ;;  %v1016_v60 = vcombine.low %v4928_v27, %v4915_v2  ;;  %v1539_v15 = vcombine.high %v4759_v46, %v4749_v8  ;;  %v1507_v8 = vcombine.high %v4776_v5, %v4756_v44 }
 0x1cf   : > { %3198 = vrot.lane.b32.xlu0 %v1559_v3, %s4005_s27  ;;  %3136 = vrot.lane.b32.xlu1 %v6545_v45, %s4003_s25  ;;  %v2155_v3 = vcombine.high %v6549_v0, %v6548_v34  ;;  %v4940_v45 = vpop.permute.xlu1 %759  ;;  %v4957_v34 = vrot.slane %v1563_v54, %v4207_v57  ;;  %v4975_v54 = vrot.slane %v2123_v26, %v4207_v57 }
 0x1d0   : > { %6552 = vst [vmem:[#allocation26_spill] sm:$0xff] %v4940_v45  ;;  %v1674_v0 = vcombine.low %v4936_v14, %v4923_v63  ;;  %v4978_v56 = vrot.slane %v1098_v51, %v4246_v29  ;;  %v2083_v44 = vcombine.high %v4798_v49, %v4786_v37  ;;  %v4996_v53 = vrot.slane %v1539_v15, %v4246_v29 }
 0x1d1   : > { %v4964_v35 = vrot.slane %v2155_v3, %v4207_v57  ;;  %v1642_v46 = vcombine.low %v4957_v34, %v4933_v28  ;;  %v4981_v3 = vrot.slane %v2139_v62, %v4207_v57  ;;  %v5009_v37 = vrot.slane %v2699_v11, %v4207_v57 }
 0x1d2   : > { %v1150_v21 = vcombine.low %v4978_v56, %v4952_v50  ;;  %v4999_v33 = vrot.slane %v1674_v0, %v4246_v29  ;;  %v2051_v49 = vcombine.high %v4811_v43, %v4795_v23  ;;  %v5014_v55 = vrot.slane %v1507_v8, %v4246_v29  ;;  %v6560_v8 = vld [vmem:[#allocation8_spill] sm:$0xff] }
 0x1d3   : > { %3202 = vrot.lane.b32.xlu0 %v2103_v6, %s4005_s27  ;;  %3140 = vrot.lane.b32.xlu1 %v6555_v41, %s4003_s25  ;;  %v6556_v6 = vld [vmem:[#allocation64_spill] sm:$0xff]  ;;  %v4991_v5 = vpop.permute.xlu1 %770  ;;  %v2218_v58 = vcombine.low %v4981_v3, %v4964_v35  ;;  %v5017_v38 = vrot.slane %v1642_v46, %v4246_v29  ;;  %v5022_v26 = vrot.slane %v2667_v4, %v4207_v57  ;;  %v6561_v46 = vld [vmem:[#allocation5_spill] sm:$0xff] }
 0x1d4   : > { %v2107_v30 = vcombine.high %v6557_v32, %v6556_v6  ;;  %6558 = vst [vmem:[#allocation23_spill] sm:$0xff] %v4991_v5  ;;  %v1560_v48 = vcombine.low %v5014_v55, %v4996_v53  ;;  %v5034_v43 = vrot.slane %v2083_v44, %v4246_v29  ;;  %v2627_v62 = vcombine.high %v4829_v12, %v4818_v10  ;;  %v6563_v44 = vld [vmem:[#allocation9_spill] sm:$0xff] }
 0x1d5   : > { %v1694_v23 = vcombine.low %v5017_v38, %v4999_v33  ;;  %v5039_v41 = vrot.slane %v2651_v7, %v4207_v57  ;;  %v5044_v15 = vrot.slane %v2218_v58, %v4246_v29  ;;  %v5049_v6 = vrot.slane %v2051_v49, %v4246_v29  ;;  %v6564_v58 = vld [vmem:[#allocation12_spill] sm:$0xff]  ;;  %v6565_v7 = vld [vmem:[#allocation10_spill] sm:$0xff] }
 0x1d6   : > { %v5002_v1 = vrot.slane %v2107_v30, %v4207_v57  ;;  %v2595_v32 = vcombine.high %v4837_v42, %v4826_v36  ;;  %v1170_v4 = vcombine.low %v6561_v46, %v6560_v8  ;;  %v1202_v49 = vcombine.low %v6565_v7, %v6564_v58  ;;  %v6569_v7 = vld [vmem:[#allocation34_spill] sm:$0xff] }
 0x1d7   : > { %3206 = vrot.lane.b32.xlu0 %v2647_v22, %s4005_s27  ;;  %3144 = vrot.lane.b32.xlu1 %v2781_v24, %s4003_s25  ;;  %v5046_v0 = vpop.permute.xlu1 %781  ;;  %v2730_v10 = vcombine.low %v5039_v41, %v5022_v26  ;;  %v2104_v30 = vcombine.low %v5049_v6, %v5034_v43  ;;  %v5062_v22 = vrot.slane %v2627_v62, %v4246_v29  ;;  %v6576_v46 = vld [vmem:[#allocation42_spill] sm:$0xff] }
 0x1d8   : > { %v2186_v51 = vcombine.low %v5002_v1, %v4975_v54  ;;  %6559 = vst [vmem:[#allocation21_spill] sm:$0xff] %v5046_v0  ;;  %v5070_v36 = vrot.slane %v2595_v32, %v4246_v29  ;;  %v1017_v13 = vcombine.high %v4928_v27, %v4915_v2 }
 0x1d9   : > { %v5073_v42 = vrot.slane %v2730_v10, %v4246_v29  ;;  %v5092_v10 = vrot.slane %v1170_v4, %v4207_v57  ;;  %v6571_v4 = vld [vmem:[#allocation35_spill] sm:$0xff] }
 0x1da   : > { %v2194_v12 = vrot.slane %v2186_v51, %v4246_v29 }
 0x1db   : > { %3226 = vrot.lane.b32.xlu0 %v1016_v60, %s4006_s28  ;;  %3164 = vrot.lane.b32.xlu1 %v1150_v21, %s4004_s26  ;;  %v2762_v60 = vcombine.low %v5025_v59, %v5009_v37  ;;  %v1186_v21 = vcombine.low %v6563_v44, %v6562_v20  ;;  %v5081_v51 = vpop.permute.xlu1 %792  ;;  %v6572_v44 = vld [vmem:[#allocation33_spill] sm:$0xff] }
 0x1dc   : > { %v2238_v11 = vcombine.low %v2194_v12, %v5044_v15  ;;  %6566 = vst [vmem:[#allocation16_spill] sm:$0xff] %v5081_v51  ;;  %v1714_v20 = vcombine.low %v6572_v44, %v6571_v4  ;;  %v6585_v44 = vld [vmem:[#allocation77_spill] sm:$0xff] }
 0x1dd   : > { %v5065_v24 = vrot.slane %v2762_v60, %v4246_v29  ;;  %v2648_v60 = vcombine.low %v5070_v36, %v5062_v22 }
 0x1df   : > { %3230 = vrot.lane.b32.xlu0 %v1560_v48, %s4006_s28  ;;  %3168 = vrot.lane.b32.xlu1 %v1694_v23, %s4004_s26  ;;  %v6567_v48 = vld [vmem:[#allocation7_spill] sm:$0xff]  ;;  %v6568_v23 = vld [vmem:[#allocation6_spill] sm:$0xff]  ;;  %v2782_v32 = vcombine.low %v5073_v42, %v5065_v24 }
 0x1e0   : > { %v1154_v62 = vcombine.low %v6568_v23, %v6567_v48  ;;  %v6574_v23 = vld [vmem:[#allocation37_spill] sm:$0xff] }
 0x1e2   : > { %v5101_v17 = vrot.slane %v1154_v62, %v4207_v57  ;;  %v5115_v62 = vpop.permute.xlu1 %803 }
 0x1e3   : > { %3234 = vrot.lane.b32.xlu0 %v2104_v30, %s4006_s28  ;;  %3172 = vrot.lane.b32.xlu1 %v2238_v11, %s4004_s26  ;;  %v5095_v30 = vrot.slane %v1186_v21, %v4207_v57  ;;  %v5098_v11 = vrot.slane %v1202_v49, %v4207_v57  ;;  %v6573_v21 = vld [vmem:[#allocation44_spill] sm:$0xff]  ;;  %v6575_v49 = vld [vmem:[#allocation47_spill] sm:$0xff]  ;;  %6577 = vst [vmem:[#allocation20_spill] sm:$0xff] %v5115_v62 }
 0x1e4   : > { %v1730_v48 = vcombine.low %v6574_v23, %v6573_v21  ;;  %v1746_v8 = vcombine.low %v6576_v46, %v6575_v49  ;;  %v1218_v2 = vcombine.low %v5101_v17, %v5092_v10  ;;  %v1561_v46 = vcombine.high %v5014_v55, %v4996_v53  ;;  %v6580_v21 = vld [vmem:[#allocation72_spill] sm:$0xff]  ;;  %v6581_v53 = vld [vmem:[#allocation67_spill] sm:$0xff] }
 0x1e5   : > { %v1250_v27 = vcombine.low %v5095_v30, %v5098_v11  ;;  %v5135_v49 = vrot.slane %v1714_v20, %v4207_v57  ;;  %v2258_v55 = vcombine.low %v6581_v53, %v6580_v21 }
 0x1e6   : > { %v5138_v23 = vrot.slane %v1730_v48, %v4207_v57  ;;  %v5153_v4 = vpop.permute.xlu1 %814 }
 0x1e7   : > { %3238 = vrot.lane.b32.xlu0 %v2648_v60, %s4006_s28  ;;  %3176 = vrot.lane.b32.xlu1 %v2782_v32, %s4004_s26  ;;  %v1151_v60 = vcombine.high %v4978_v56, %v4952_v50  ;;  %v6570_v32 = vld [vmem:[#allocation32_spill] sm:$0xff]  ;;  %v1099_v50 = vcombine.high %v4918_v19, %v4901_v25  ;;  %v1131_v56 = vcombine.high %v4898_v40, %v4882_v16  ;;  %v6578_v19 = vld [vmem:[#allocation70_spill] sm:$0xff]  ;;  %v6579_v16 = vld [vmem:[#allocation65_spill] sm:$0xff] }
 0x1e8   : > { %v1698_v58 = vcombine.low %v6570_v32, %v6569_v7  ;;  %v5141_v25 = vrot.slane %v1746_v8, %v4207_v57  ;;  %v2242_v40 = vcombine.low %v6579_v16, %v6578_v19  ;;  %6586 = vst [vmem:[#allocation14_spill] sm:$0xff] %v5153_v4  ;;  %v2105_v8 = vcombine.high %v5049_v6, %v5034_v43 }
 0x1e9   : > { %v2239_v16 = vcombine.high %v2194_v12, %v5044_v15  ;;  %v5159_v19 = vrot.slane %v1218_v2, %v4246_v29  ;;  %v1675_v43 = vcombine.high %v4936_v14, %v4923_v63  ;;  %v5180_v6 = vrot.slane %v2258_v55, %v4207_v57 }
 0x1ea   : > { %v5177_v15 = vrot.slane %v2242_v40, %v4207_v57  ;;  %v2802_v63 = vcombine.low %v4852_v61, %v4893_v52  ;;  %v2818_v14 = vcombine.low %v4940_v45, %v5046_v0  ;;  %v1643_v40 = vcombine.high %v4957_v34, %v4933_v28  ;;  %v5204_v55 = vpop.permute.xlu1 %825  ;;  %v6595_v45 = vld [vmem:[#allocation15_spill] sm:$0xff]  ;;  %v6597_v61 = vld [vmem:[#allocation24_spill] sm:$0xff] }
 0x1eb   : > { %3258 = vrot.lane.b32.xlu0 %v1017_v13, %s4007_s29  ;;  %3196 = vrot.lane.b32.xlu1 %v1151_v60, %s4005_s27  ;;  %v1695_v13 = vcombine.high %v5017_v38, %v4999_v33  ;;  %v5132_v60 = vrot.slane %v1698_v58, %v4207_v57  ;;  %v6582_v33 = vld [vmem:[#allocation78_spill] sm:$0xff]  ;;  %v6584_v58 = vld [vmem:[#allocation79_spill] sm:$0xff]  ;;  %6587 = vst [vmem:[#allocation50_spill] sm:$0xff] %v5204_v55 }
 0x1ec   : > { %v6583_v38 = vld [vmem:[#allocation74_spill] sm:$0xff]  ;;  %v2290_v48 = vcombine.low %v6585_v44, %v6584_v58  ;;  %v5169_v44 = vrot.slane %v1099_v50, %v4246_v29  ;;  %v5172_v58 = vrot.slane %v1131_v56, %v4246_v29  ;;  %v2834_v50 = vcombine.low %v4991_v5, %v5081_v51 }
 0x1ed   : > { %v2274_v20 = vcombine.low %v6583_v38, %v6582_v33  ;;  %v1794_v38 = vcombine.low %v5138_v23, %v5141_v25  ;;  %v2649_v56 = vcombine.high %v5070_v36, %v5062_v22  ;;  %v2306_v28 = vcombine.low %v5177_v15, %v5180_v6 }
 0x1ee   : > { %v5188_v2 = vrot.slane %v2290_v48, %v4207_v57  ;;  %v1152_v48 = vcombine.low %v5169_v44, %v5172_v58  ;;  %v2219_v36 = vcombine.high %v4981_v3, %v4964_v35  ;;  %v2187_v35 = vcombine.high %v5002_v1, %v4975_v54  ;;  %v5244_v3 = vpop.permute.xlu0 %3066 }
 0x1ef   : > { %3262 = vrot.lane.b32.xlu0 %v1561_v46, %s4007_s29  ;;  %3200 = vrot.lane.b32.xlu1 %v1695_v13, %s4005_s27  ;;  %v5162_v46 = vrot.slane %v1250_v27, %v4246_v29  ;;  %v1762_v13 = vcombine.low %v5132_v60, %v5135_v49  ;;  %v5185_v12 = vrot.slane %v2274_v20, %v4207_v57 }
 0x1f0   : > { %v2786_v27 = vcombine.low %v4820_v47, %v4869_v39  ;;  %6588 = vst [vmem:[#allocation46_spill] sm:$0xff] %v5244_v3  ;;  %v6599_v47 = vld [vmem:[#allocation27_spill] sm:$0xff]  ;;  %v1251_v3 = vcombine.high %v5095_v30, %v5098_v11  ;;  %v6603_v30 = vld [vmem:[#allocation49_spill] sm:$0xff] }
 0x1f1   : > { %v1282_v20 = vcombine.low %v5159_v19, %v5162_v46  ;;  %v5213_v22 = vrot.slane %v1762_v13, %v4246_v29  ;;  %v2338_v34 = vcombine.low %v5185_v12, %v5188_v2  ;;  %v5231_v13 = vrot.slane %v2802_v63, %v4207_v57 }
 0x1f2   : > { %v5278_v5 = vpop.permute.xlu0 %3070 }
 0x1f3   : > { %3266 = vrot.lane.b32.xlu0 %v2105_v8, %s4007_s29  ;;  %3204 = vrot.lane.b32.xlu1 %v2239_v16, %s4005_s27  ;;  %v2783_v16 = vcombine.high %v5073_v42, %v5065_v24  ;;  %v5216_v24 = vrot.slane %v1794_v38, %v4246_v29  ;;  %v5225_v42 = vrot.slane %v1675_v43, %v4246_v29  ;;  %v5248_v43 = vpop.permute.xlu1 %836 }
 0x1f4   : > { %v5228_v8 = vrot.slane %v2786_v27, %v4207_v57  ;;  %v5234_v38 = vrot.slane %v2818_v14, %v4207_v57  ;;  %6589 = vst [vmem:[#allocation43_spill] sm:$0xff] %v5248_v43  ;;  %v5255_v14 = vrot.slane %v2306_v28, %v4246_v29  ;;  %v5258_v54 = vrot.slane %v2338_v34, %v4246_v29 }
 0x1f5   : > { %v1826_v27 = vcombine.low %v5213_v22, %v5216_v24  ;;  %v5274_v28 = vrot.slane %v2187_v35, %v4246_v29  ;;  %6590 = vst [vmem:[#allocation38_spill] sm:$0xff] %v5278_v5 }
 0x1f6   : > { %v2850_v1 = vcombine.low %v5228_v8, %v5231_v13  ;;  %v2370_v34 = vcombine.low %v5255_v14, %v5258_v54  ;;  %v5306_v5 = vpop.permute.xlu0 %3074 }
 0x1f7   : > { %3270 = vrot.lane.b32.xlu0 %v2649_v56, %s4007_s29  ;;  %3208 = vrot.lane.b32.xlu1 %v2783_v16, %s4005_s27  ;;  %v5237_v56 = vrot.slane %v2834_v50, %v4207_v57  ;;  %v5240_v16 = vrot.slane %v1643_v40, %v4246_v29  ;;  %v2763_v40 = vcombine.high %v5025_v59, %v5009_v37 }
 0x1f8   : > { %v5283_v59 = vrot.slane %v2850_v1, %v4246_v29  ;;  %v6594_v1 = vld [vmem:[#allocation22_spill] sm:$0xff]  ;;  %6600 = vst [vmem:[#allocation45_spill] sm:$0xff] %v5306_v5 }
 0x1f9   : > { %v1696_v63 = vcombine.low %v5240_v16, %v5225_v42  ;;  %v2882_v50 = vcombine.low %v5234_v38, %v5237_v56  ;;  %v1306_v0 = vcombine.low %v6595_v45, %v6594_v1  ;;  %v6605_v45 = vld [vmem:[#allocation51_spill] sm:$0xff] }
 0x1fb   : > { %3290 = vrot.lane.b32.xlu0 %v1282_v20, %s4008_s30  ;;  %3228 = vrot.lane.b32.xlu1 %v1152_v48, %s4006_s28  ;;  %v5267_v20 = vrot.slane %v2219_v36, %v4246_v29  ;;  %v2731_v48 = vcombine.high %v5039_v41, %v5022_v26  ;;  %v5286_v26 = vrot.slane %v2882_v50, %v4246_v29  ;;  %v5291_v36 = vpop.permute.xlu1 %847  ;;  %v6596_v50 = vld [vmem:[#allocation28_spill] sm:$0xff] }
 0x1fc   : > { %v5289_v41 = vrot.slane %v2763_v40, %v4246_v29  ;;  %6591 = vst [vmem:[#allocation48_spill] sm:$0xff] %v5291_v36  ;;  %v1322_v52 = vcombine.low %v6597_v61, %v6596_v50  ;;  %v6598_v40 = vld [vmem:[#allocation31_spill] sm:$0xff]  ;;  %v5326_v61 = vrot.slane %v1306_v0, %v4207_v57  ;;  %v6607_v0 = vld [vmem:[#allocation56_spill] sm:$0xff] }
 0x1fd   : > { %v2240_v37 = vcombine.low %v5274_v28, %v5267_v20  ;;  %v5296_v35 = vrot.slane %v2731_v48, %v4246_v29  ;;  %v1338_v39 = vcombine.low %v6599_v47, %v6598_v40  ;;  %v1283_v40 = vcombine.high %v5159_v19, %v5162_v46  ;;  %v6604_v50 = vld [vmem:[#allocation55_spill] sm:$0xff]  ;;  %v6606_v46 = vld [vmem:[#allocation58_spill] sm:$0xff] }
 0x1fe   : > { %v1850_v19 = vcombine.low %v6605_v45, %v6604_v50  ;;  %v1866_v1 = vcombine.low %v6607_v0, %v6606_v46 }
 0x1ff   : > { %3294 = vrot.lane.b32.xlu0 %v1826_v27, %s4008_s30  ;;  %3232 = vrot.lane.b32.xlu1 %v1696_v63, %s4006_s28  ;;  %v6592_v27 = vld [vmem:[#allocation19_spill] sm:$0xff]  ;;  %v6593_v63 = vld [vmem:[#allocation13_spill] sm:$0xff]  ;;  %v2784_v48 = vcombine.low %v5296_v35, %v5289_v41  ;;  %v5321_v5 = vpop.permute.xlu1 %858 }
 0x200   : > { %v1290_v51 = vcombine.low %v6593_v63, %v6592_v27  ;;  %6601 = vst [vmem:[#allocation41_spill] sm:$0xff] %v5321_v5  ;;  %v6608_v63 = vld [vmem:[#allocation62_spill] sm:$0xff]  ;;  %v5377_v50 = vrot.slane %v1866_v1, %v4207_v57  ;;  %v2426_v1 = vcombine.low %v4688_v31, %v4782_v9 }
 0x202   : > { %v5319_v47 = vrot.slane %v1290_v51, %v4207_v57  ;;  %v1153_v51 = vcombine.high %v5169_v44, %v5172_v58  ;;  %v5352_v44 = vrot.slane %v1251_v3, %v4246_v29  ;;  %v1795_v3 = vcombine.high %v5138_v23, %v5141_v25  ;;  %v6613_v23 = vld [vmem:[#allocation85_spill] sm:$0xff] }
 0x203   : > { %3298 = vrot.lane.b32.xlu0 %v2370_v34, %s4008_s30  ;;  %3236 = vrot.lane.b32.xlu1 %v2240_v37, %s4006_s28  ;;  %v2914_v34 = vcombine.low %v5283_v59, %v5286_v26  ;;  %v1219_v37 = vcombine.high %v5101_v17, %v5092_v10  ;;  %v6602_v10 = vld [vmem:[#allocation54_spill] sm:$0xff]  ;;  %v5374_v45 = vpop.permute.xlu1 %869 }
 0x204   : > { %v1834_v11 = vcombine.low %v6603_v30, %v6602_v10  ;;  %v1354_v58 = vcombine.low %v5319_v47, %v5326_v61  ;;  %6610 = vst [vmem:[#allocation36_spill] sm:$0xff] %v5374_v45  ;;  %v6625_v30 = vld [vmem:[#allocation12_spill] sm:$0xff] }
 0x207   : > { %3302 = vrot.lane.b32.xlu0 %v2914_v34, %s4008_s30  ;;  %3240 = vrot.lane.b32.xlu1 %v2784_v48, %s4006_s28  ;;  %v5329_v34 = vrot.slane %v1322_v52, %v4207_v57  ;;  %v5332_v48 = vrot.slane %v1338_v39, %v4207_v57  ;;  %v6609_v52 = vld [vmem:[#allocation57_spill] sm:$0xff]  ;;  %v5349_v39 = vrot.slane %v1219_v37, %v4246_v29 }
 0x208   : > { %v1882_v27 = vcombine.low %v6609_v52, %v6608_v63  ;;  %v1827_v52 = vcombine.high %v5213_v22, %v5216_v24  ;;  %v1763_v37 = vcombine.high %v5132_v60, %v5135_v49  ;;  %v5372_v63 = vrot.slane %v1850_v19, %v4207_v57  ;;  %v6611_v24 = vld [vmem:[#allocation84_spill] sm:$0xff]  ;;  %v6614_v60 = vld [vmem:[#allocation81_spill] sm:$0xff] }
 0x209   : > { %v5334_v17 = vpop.permute.xlu0 %3078  ;;  %v1386_v0 = vcombine.low %v5329_v34, %v5332_v48  ;;  %v2394_v25 = vcombine.low %v6614_v60, %v6613_v23  ;;  %v6623_v23 = vld [vmem:[#allocation11_spill] sm:$0xff] }
 0x20a   : > { %v5380_v22 = vrot.slane %v1882_v27, %v4207_v57  ;;  %v1284_v27 = vcombine.low %v5349_v39, %v5352_v44  ;;  %v5404_v60 = vrot.slane %v1763_v37, %v4246_v29  ;;  %v5428_v37 = vrot.slane %v2426_v1, %v4207_v57 }
 0x20b   : > { %3322 = vrot.lane.b32.xlu0 %v1283_v40, %s4009_s2  ;;  %3260 = vrot.lane.b32.xlu1 %v1153_v51, %s4007_s29  ;;  %v1697_v40 = vcombine.high %v5240_v16, %v5225_v42  ;;  %v5369_v51 = vrot.slane %v1834_v11, %v4207_v57  ;;  %v6612_v42 = vld [vmem:[#allocation80_spill] sm:$0xff]  ;;  %v6615_v16 = vld [vmem:[#allocation86_spill] sm:$0xff]  ;;  %v5410_v31 = vrot.slane %v1386_v0, %v4246_v29 }
 0x20c   : > { %v2378_v49 = vcombine.low %v6612_v42, %v6611_v24  ;;  %v2410_v11 = vcombine.low %v6615_v16, %v4731_v18  ;;  %v2241_v42 = vcombine.high %v5274_v28, %v5267_v20  ;;  %v5407_v16 = vrot.slane %v1795_v3, %v4246_v29 }
 0x20d   : > { %v5358_v46 = vpop.permute.xlu0 %3098  ;;  %v1930_v9 = vcombine.low %v5377_v50, %v5380_v22  ;;  %v2371_v28 = vcombine.high %v5255_v14, %v5258_v54  ;;  %v2922_v3 = vcombine.low %v5115_v62, %v5204_v55  ;;  %v2954_v14 = vcombine.low %v5291_v36, %v5374_v45  ;;  %v6621_v55 = vld [vmem:[#allocation7_spill] sm:$0xff] }
 0x20e   : > { %v5415_v20 = vrot.slane %v2378_v49, %v4207_v57  ;;  %v5425_v0 = vrot.slane %v2410_v11, %v4207_v57  ;;  %v5432_v49 = vpop.permute.xlu1 %880  ;;  %v2785_v11 = vcombine.high %v5296_v35, %v5289_v41  ;;  %v1828_v1 = vcombine.low %v5404_v60, %v5407_v16 }
 0x20f   : > { %3326 = vrot.lane.b32.xlu0 %v1827_v52, %s4009_s2  ;;  %3264 = vrot.lane.b32.xlu1 %v1697_v40, %s4007_s29  ;;  %v5399_v52 = vrot.slane %v1354_v58, %v4246_v29  ;;  %v1898_v40 = vcombine.low %v5369_v51, %v5372_v63  ;;  %v5422_v58 = vrot.slane %v2394_v25, %v4207_v57 }
 0x210   : > { %6616 = vst [vmem:[#allocation73_spill] sm:$0xff] %v5432_v49  ;;  %v2970_v54 = vcombine.low %v5321_v5, %v5432_v49  ;;  %v2474_v5 = vcombine.low %v5425_v0, %v5428_v37  ;;  %v5458_v41 = vrot.slane %v1930_v9, %v4246_v29  ;;  %v5461_v35 = vrot.slane %v2922_v3, %v4207_v57  ;;  %v6622_v9 = vld [vmem:[#allocation6_spill] sm:$0xff]  ;;  %v6624_v3 = vld [vmem:[#allocation9_spill] sm:$0xff] }
 0x211   : > { %v5392_v19 = vpop.permute.xlu0 %3102  ;;  %v2442_v36 = vcombine.low %v5415_v20, %v5422_v58  ;;  %v5455_v49 = vrot.slane %v1898_v40, %v4246_v29  ;;  %v6620_v40 = vld [vmem:[#allocation5_spill] sm:$0xff]  ;;  %v1155_v18 = vcombine.high %v6622_v9, %v6621_v55  ;;  %v1187_v24 = vcombine.high %v6624_v3, %v6623_v23 }
 0x212   : > { %v5470_v45 = vrot.slane %v2970_v54, %v4207_v57  ;;  %v1285_v55 = vcombine.high %v5349_v39, %v5352_v44 }
 0x213   : > { %3354 = vrot.lane.b32.xlu0 %v1284_v27, %s4010_s3  ;;  %3268 = vrot.lane.b32.xlu1 %v2241_v42, %s4007_s29  ;;  %v2938_v42 = vcombine.low %v5153_v4, %v5248_v43  ;;  %v1418_v27 = vcombine.low %v5399_v52, %v5410_v31  ;;  %v6619_v43 = vld [vmem:[#allocation8_spill] sm:$0xff]  ;;  %v1962_v23 = vcombine.low %v5455_v49, %v5458_v41 }
 0x214   : > { %v1171_v62 = vcombine.high %v6620_v40, %v6619_v43  ;;  %v2339_v43 = vcombine.high %v5185_v12, %v5188_v2  ;;  %v5510_v12 = vrot.slane %v1187_v24, %v4207_v57 }
 0x215   : > { %v5440_v25 = vpop.permute.xlu0 %3106 }
 0x216   : > { %6617 = vst [vmem:[#allocation69_spill] sm:$0xff] %v5440_v25  ;;  %v5482_v25 = vpop.permute.xlu1 %3068 }
 0x217   : > { %3330 = vrot.lane.b32.xlu0 %v2371_v28, %s4009_s2  ;;  %3272 = vrot.lane.b32.xlu1 %v2785_v11, %s4007_s29  ;;  %v5464_v28 = vrot.slane %v2938_v42, %v4207_v57  ;;  %v5467_v11 = vrot.slane %v2954_v14, %v4207_v57  ;;  %v6626_v42 = vld [vmem:[#allocation10_spill] sm:$0xff]  ;;  %6627 = vst [vmem:[#allocation63_spill] sm:$0xff] %v5482_v25 }
 0x218   : > { %v1203_v10 = vcombine.high %v6626_v42, %v6625_v30  ;;  %v2307_v14 = vcombine.high %v5177_v15, %v5180_v6  ;;  %v5504_v15 = vrot.slane %v2474_v5, %v4246_v29  ;;  %v5507_v6 = vrot.slane %v1171_v62, %v4207_v57 }
 0x219   : > { %6618 = vst [vmem:[#allocation66_spill] sm:$0xff] %v5467_v11  ;;  %v5472_v4 = vpop.permute.xlu0 %3110  ;;  %v2986_v30 = vcombine.low %v5461_v35, %v5464_v28  ;;  %v3018_v54 = vcombine.low %v5467_v11, %v5470_v45  ;;  %v5524_v62 = vrot.slane %v2339_v43, %v4246_v29 }
 0x21a   : > { %v5513_v2 = vrot.slane %v1203_v10, %v4207_v57  ;;  %v5521_v5 = vrot.slane %v2307_v14, %v4246_v29  ;;  %v5526_v39 = vpop.permute.xlu1 %3072  ;;  %v2915_v10 = vcombine.high %v5283_v59, %v5286_v26 }
 0x21b   : > { %3358 = vrot.lane.b32.xlu0 %v1828_v1, %s4010_s3  ;;  %3292 = vrot.lane.b32.xlu1 %v1418_v27, %s4008_s30  ;;  %v5501_v27 = vrot.slane %v2442_v36, %v4246_v29  ;;  %v5518_v36 = vrot.slane %v1155_v18, %v4207_v57  ;;  %6628 = vst [vmem:[#allocation71_spill] sm:$0xff] %v5526_v39  ;;  %v6633_v39 = vld [vmem:[#allocation37_spill] sm:$0xff] }
 0x21c   : > { %v5535_v40 = vrot.slane %v2986_v30, %v4246_v29  ;;  %v5538_v18 = vrot.slane %v3018_v54, %v4246_v29  ;;  %v1266_v3 = vcombine.low %v5510_v12, %v5513_v2  ;;  %v2372_v42 = vcombine.low %v5521_v5, %v5524_v62 }
 0x21d   : > { %v5498_v1 = vpop.permute.xlu0 %3130  ;;  %v2506_v24 = vcombine.low %v5501_v27, %v5504_v15  ;;  %v1234_v9 = vcombine.low %v5518_v36, %v5507_v6  ;;  %v1699_v54 = vcombine.high %v6570_v32, %v6569_v7  ;;  %v1829_v7 = vcombine.high %v5404_v60, %v5407_v16 }
 0x21e   : > { %v5546_v59 = vpop.permute.xlu1 %3076  ;;  %v3050_v14 = vcombine.low %v5535_v40, %v5538_v18  ;;  %v5564_v30 = vrot.slane %v1266_v3, %v4246_v29  ;;  %v1419_v32 = vcombine.high %v5399_v52, %v5410_v31  ;;  %v1963_v52 = vcombine.high %v5455_v49, %v5458_v41 }
 0x21f   : > { %3386 = vrot.lane.b32.xlu0 %v1285_v55, %s4011_s4  ;;  %3296 = vrot.lane.b32.xlu1 %v1962_v23, %s4008_s30  ;;  %6629 = vst [vmem:[#allocation68_spill] sm:$0xff] %v5546_v59  ;;  %v5555_v43 = vrot.slane %v1234_v9, %v4246_v29  ;;  %v1355_v55 = vcombine.high %v5319_v47, %v5326_v61  ;;  %v6632_v59 = vld [vmem:[#allocation44_spill] sm:$0xff]  ;;  %v6634_v47 = vld [vmem:[#allocation47_spill] sm:$0xff]  ;;  %v6635_v61 = vld [vmem:[#allocation42_spill] sm:$0xff] }
 0x220   : > { %v1387_v23 = vcombine.high %v5329_v34, %v5332_v48  ;;  %v1731_v25 = vcombine.high %v6633_v39, %v6632_v59  ;;  %v1747_v11 = vcombine.high %v6635_v61, %v6634_v47  ;;  %v2851_v34 = vcombine.high %v5228_v8, %v5231_v13  ;;  %v6637_v47 = vld [vmem:[#allocation65_spill] sm:$0xff] }
 0x221   : > { %v5528_v44 = vpop.permute.xlu0 %3134  ;;  %v2883_v48 = vcombine.high %v5234_v38, %v5237_v56  ;;  %v1286_v39 = vcombine.low %v5555_v43, %v5564_v30  ;;  %v5589_v8 = vrot.slane %v1355_v55, %v4246_v29  ;;  %v5592_v13 = vrot.slane %v1699_v54, %v4207_v57 }
 0x222   : > { %v5598_v56 = vrot.slane %v1731_v25, %v4207_v57  ;;  %v5601_v31 = vrot.slane %v1747_v11, %v4207_v57  ;;  %v5610_v59 = vrot.slane %v2851_v34, %v4246_v29  ;;  %v5616_v55 = vrot.slane %v1387_v23, %v4246_v29 }
 0x223   : > { %3334 = vrot.lane.b32.xlu0 %v2915_v10, %s4009_s2  ;;  %3300 = vrot.lane.b32.xlu1 %v2506_v24, %s4008_s30  ;;  %v6630_v10 = vld [vmem:[#allocation35_spill] sm:$0xff]  ;;  %v6631_v24 = vld [vmem:[#allocation33_spill] sm:$0xff]  ;;  %v1899_v41 = vcombine.high %v5369_v51, %v5372_v63  ;;  %v1931_v11 = vcombine.high %v5377_v50, %v5380_v22  ;;  %v2259_v34 = vcombine.high %v6581_v53, %v6580_v21  ;;  %v6638_v63 = vld [vmem:[#allocation74_spill] sm:$0xff] }
 0x224   : > { %v1715_v9 = vcombine.high %v6631_v24, %v6630_v10  ;;  %v1810_v49 = vcombine.low %v5598_v56, %v5601_v31  ;;  %v1420_v24 = vcombine.low %v5589_v8, %v5616_v55  ;;  %v2275_v51 = vcombine.high %v6638_v63, %v6582_v33  ;;  %v6639_v50 = vld [vmem:[#allocation79_spill] sm:$0xff]  ;;  %v6640_v22 = vld [vmem:[#allocation77_spill] sm:$0xff]  ;;  %v6644_v63 = vld [vmem:[#allocation22_spill] sm:$0xff] }
 0x225   : > { %v5548_v26 = vpop.permute.xlu0 %3138  ;;  %v5655_v21 = vrot.slane %v1899_v41, %v4246_v29  ;;  %v5672_v41 = vrot.slane %v2259_v34, %v4207_v57  ;;  %v6649_v34 = vld [vmem:[#allocation28_spill] sm:$0xff] }
 0x226   : > { %v5595_v38 = vrot.slane %v1715_v9, %v4207_v57  ;;  %v6636_v9 = vld [vmem:[#allocation70_spill] sm:$0xff] }
 0x227   : > { %3362 = vrot.lane.b32.xlu0 %v2372_v42, %s4010_s3  ;;  %3304 = vrot.lane.b32.xlu1 %v3050_v14, %s4008_s30  ;;  %v5613_v14 = vrot.slane %v2883_v48, %v4246_v29  ;;  %v2243_v61 = vcombine.high %v6637_v47, %v6636_v9  ;;  %v2291_v48 = vcombine.high %v6640_v22, %v6639_v50  ;;  %v6642_v47 = vld [vmem:[#allocation19_spill] sm:$0xff] }
 0x228   : > { %v1778_v25 = vcombine.low %v5592_v13, %v5595_v38  ;;  %v6647_v50 = vld [vmem:[#allocation83_spill] sm:$0xff] }
 0x229   : > { %v5578_v3 = vpop.permute.xlu1 %3080  ;;  %v3143_v42 = vpop.permute.xlu0 %3142  ;;  %v2916_v10 = vcombine.low %v5610_v59, %v5613_v14  ;;  %v5678_v9 = vrot.slane %v2291_v48, %v4207_v57 }
 0x22b   : > { %3390 = vrot.lane.b32.xlu0 %v1829_v7, %s4011_s4  ;;  %3324 = vrot.lane.b32.xlu1 %v1419_v32, %s4009_s2  ;;  %v5649_v32 = vrot.slane %v1778_v25, %v4246_v29  ;;  %v5666_v25 = vrot.slane %v1931_v11, %v4246_v29  ;;  %v6646_v11 = vld [vmem:[#allocation82_spill] sm:$0xff]  ;;  %v6651_v7 = vld [vmem:[#allocation31_spill] sm:$0xff] }
 0x22d   : > { %v5603_v60 = vpop.permute.xlu1 %3100  ;;  %v5605_v16 = vpop.permute.xlu0 %3162 }
 0x22f   : > { %3418 = vrot.lane.b32.xlu0 %v1286_v39, %s4012_s5  ;;  %3328 = vrot.lane.b32.xlu1 %v1963_v52, %s4009_s2  ;;  %v5652_v39 = vrot.slane %v1810_v49, %v4246_v29  ;;  %v2373_v52 = vcombine.high %v5521_v5, %v5524_v62  ;;  %v5669_v49 = vrot.slane %v2243_v61, %v4207_v57  ;;  %v6643_v5 = vld [vmem:[#allocation13_spill] sm:$0xff] }
 0x230   : > { %v1291_v62 = vcombine.high %v6643_v5, %v6642_v47  ;;  %v6648_v61 = vcombine.low %v6646_v11, %v6647_v50  ;;  %v6655_v50 = vld [vmem:[#allocation18_spill] sm:$0xff] }
 0x231   : > { %v5628_v54 = vpop.permute.xlu1 %3104  ;;  %v5630_v23 = vpop.permute.xlu0 %3166  ;;  %v2322_v11 = vcombine.low %v5669_v49, %v5672_v41 }
 0x232   : > { %v3545_v22 = vsel %vm3538_vm0, %v6648_v61, %v5334_v17 }
 0x233   : > { %3366 = vrot.lane.b32.xlu0 %v2916_v10, %s4010_s3  ;;  %3356 = vrot.lane.b32.xlu1 %v1420_v24, %s4010_s3  ;;  %v2507_v10 = vcombine.high %v5501_v27, %v5504_v15  ;;  %v5675_v24 = vrot.slane %v2275_v51, %v4207_v57  ;;  %v6645_v27 = vld [vmem:[#allocation15_spill] sm:$0xff]  ;;  %v6650_v51 = vld [vmem:[#allocation24_spill] sm:$0xff]  ;;  %v3554_v5 = vsel %vm3547_vm1, %v3545_v22, %v5472_v4  ;;  %v6653_v4 = vld [vmem:[#allocation46_spill] sm:$0xff] }
 0x234   : > { %v1307_v15 = vcombine.high %v6645_v27, %v6644_v63  ;;  %v1323_v48 = vcombine.high %v6650_v51, %v6649_v34  ;;  %v3563_v63 = vsel %vm3556_vm2, %v3554_v5, %v3143_v42  ;;  %v2443_v34 = vcombine.high %v5415_v20, %v5422_v58 }
 0x235   : > { %v5657_v53 = vpop.permute.xlu1 %3108  ;;  %v5659_v33 = vpop.permute.xlu0 %3170  ;;  %v2475_v51 = vcombine.high %v5425_v0, %v5428_v37  ;;  %v1287_v58 = vcombine.high %v5555_v43, %v5564_v30 }
 0x236   : > { %6641 = vst [vmem:[#allocation64_spill] sm:$0xff] %v5657_v53  ;;  %v6652_v53 = vld [vmem:[#allocation27_spill] sm:$0xff]  ;;  %v5735_v0 = vrot.slane %v1323_v48, %v4207_v57  ;;  %v5755_v48 = vrot.slane %v2322_v11, %v4246_v29  ;;  %v6662_v11 = vld [vmem:[#allocation92_spill] sm:$0xff] }
 0x237   : > { %3394 = vrot.lane.b32.xlu0 %v2373_v52, %s4011_s4  ;;  %3332 = vrot.lane.b32.xlu1 %v2507_v10, %s4009_s2  ;;  %v1339_v47 = vcombine.high %v6652_v53, %v6651_v7  ;;  %v1830_v52 = vcombine.low %v5649_v32, %v5652_v39  ;;  %v1964_v10 = vcombine.low %v5655_v21, %v5666_v25  ;;  %v6654_v53 = vld [vmem:[#allocation17_spill] sm:$0xff] }
 0x238   : > { %v2354_v7 = vcombine.low %v5675_v24, %v5678_v9  ;;  %v6656_v42 = vcombine.low %v6654_v53, %v6655_v50  ;;  %v5725_v53 = vrot.slane %v1291_v62, %v4207_v57  ;;  %v6661_v50 = vld [vmem:[#allocation94_spill] sm:$0xff] }
 0x239   : > { %v5698_v27 = vpop.permute.xlu1 %3112  ;;  %v3175_v17 = vpop.permute.xlu0 %3174 }
 0x23a   : > { %v3539_v61 = vsel %vm3538_vm0, %v6656_v42, %v6653_v4  ;;  %v5714_v22 = vsel %vm3565_vm3, %v3563_v63, %v3175_v17  ;;  %v5728_v63 = vrot.slane %v1307_v15, %v4207_v57  ;;  %v1421_v15 = vcombine.high %v5589_v8, %v5616_v55 }
 0x23b   : > { %v3548_v5 = vsel %vm3547_vm1, %v3539_v61, %v5358_v46  ;;  %3422 = vrot.lane.b32.xlu0 %v1830_v52, %s4012_s5  ;;  %3360 = vrot.lane.b32.xlu1 %v1964_v10, %s4010_s3  ;;  %v5738_v46 = vrot.slane %v1339_v47, %v4207_v57  ;;  %v6657_v52 = vld [vmem:[#allocation38_spill] sm:$0xff]  ;;  %v6659_v10 = vld [vmem:[#allocation40_spill] sm:$0xff]  ;;  %v5765_v8 = vrot.slane %v2443_v34, %v4246_v29  ;;  %v6663_v61 = vld [vmem:[#allocation25_spill] sm:$0xff] }
 0x23c   : > { %v3557_v20 = vsel %vm3556_vm2, %v3548_v5, %v5498_v1  ;;  %v6658_v1 = vld [vmem:[#allocation39_spill] sm:$0xff]  ;;  %v5768_v55 = vrot.slane %v2475_v51, %v4246_v29  ;;  %v2787_v42 = vcombine.high %v6662_v11, %v6661_v50  ;;  %v6670_v50 = vld [vmem:[#allocation60_spill] sm:$0xff]  ;;  %v6671_v11 = vld [vmem:[#allocation61_spill] sm:$0xff] }
 0x23d   : > { %v3566_v37 = vsel %vm3565_vm3, %v3557_v20, %v5605_v16  ;;  %v5742_v62 = vpop.permute.xlu1 %3132  ;;  %v3195_v17 = vpop.permute.xlu0 %3194  ;;  %v6660_v4 = vcombine.low %v6658_v1, %v6659_v10  ;;  %v5758_v16 = vrot.slane %v2354_v7, %v4246_v29  ;;  %v6664_v7 = vld [vmem:[#allocation93_spill] sm:$0xff]  ;;  %v2917_v10 = vcombine.high %v5610_v59, %v5613_v14 }
 0x23e   : > { %v5752_v30 = vsel %vm3574_vm4, %v3566_v37, %v3195_v17  ;;  %v2803_v5 = vcombine.high %v6664_v7, %v6663_v61  ;;  %v6665_v20 = vld [vmem:[#allocation21_spill] sm:$0xff]  ;;  %v6666_v37 = vld [vmem:[#allocation26_spill] sm:$0xff]  ;;  %v6667_v17 = vld [vmem:[#allocation16_spill] sm:$0xff]  ;;  %v6672_v61 = vcombine.low %v6670_v50, %v6671_v11  ;;  %v1402_v59 = vcombine.low %v5735_v0, %v5738_v46 }
 0x23f   : > { %v3541_v43 = vsel %vm3538_vm0, %v6660_v4, %v6657_v52  ;;  %3450 = vrot.lane.b32.xlu0 %v1287_v58, %s4013_s6  ;;  %3388 = vrot.lane.b32.xlu1 %v1421_v15, %s4011_s4  ;;  %v6668_v15 = vld [vmem:[#allocation23_spill] sm:$0xff]  ;;  %v3051_v4 = vcombine.high %v5535_v40, %v5538_v18  ;;  %v6673_v14 = vld [vmem:[#allocation69_spill] sm:$0xff]  ;;  %v2374_v18 = vcombine.low %v5755_v48, %v5758_v16  ;;  %v6679_v11 = vld [vmem:[#allocation58_spill] sm:$0xff] }
 0x240   : > { %v3550_v47 = vsel %vm3547_vm1, %v3541_v43, %v5392_v19  ;;  %v2819_v19 = vcombine.high %v6666_v37, %v6665_v20  ;;  %v2835_v52 = vcombine.high %v6668_v15, %v6667_v17  ;;  %v1267_v43 = vcombine.high %v5510_v12, %v5513_v2  ;;  %v6677_v50 = vld [vmem:[#allocation55_spill] sm:$0xff] }
 0x241   : > { %v3559_v58 = vsel %vm3556_vm2, %v3550_v47, %v5528_v44  ;;  %v5782_v51 = vpop.permute.xlu1 %3136  ;;  %v3199_v1 = vpop.permute.xlu0 %3198  ;;  %v1370_v44 = vcombine.low %v5725_v53, %v5728_v63  ;;  %v6669_v47 = vld [vmem:[#allocation45_spill] sm:$0xff]  ;;  %v5807_v12 = vrot.slane %v2787_v42, %v4207_v57  ;;  %v2508_v20 = vcombine.low %v5765_v8, %v5768_v55 }
 0x242   : > { %v3568_v34 = vsel %vm3565_vm3, %v3559_v58, %v5630_v23  ;;  %v3543_v23 = vsel %vm3538_vm0, %v6672_v61, %v6669_v47  ;;  %v5816_v37 = vrot.slane %v2803_v5, %v4207_v57  ;;  %v5819_v58 = vrot.slane %v2819_v19, %v4207_v57  ;;  %v6680_v61 = vld [vmem:[#allocation56_spill] sm:$0xff] }
 0x243   : > { %v5798_v7 = vsel %vm3574_vm4, %v3568_v34, %v3199_v1  ;;  %v3552_v40 = vsel %vm3547_vm1, %v3543_v23, %v6673_v14  ;;  %3398 = vrot.lane.b32.xlu0 %v2917_v10, %s4011_s4  ;;  %3336 = vrot.lane.b32.xlu1 %v3051_v4, %s4009_s2  ;;  %v5822_v17 = vrot.slane %v2835_v52, %v4207_v57  ;;  %v6675_v10 = vld [vmem:[#allocation54_spill] sm:$0xff]  ;;  %v6682_v14 = vld [vmem:[#allocation57_spill] sm:$0xff] }
 0x244   : > { %v3561_v2 = vsel %vm3556_vm2, %v3552_v40, %v5548_v26  ;;  %v5832_v1 = vrot.slane %v1370_v44, %v4246_v29  ;;  %v6674_v5 = vcombine.high %v5518_v36, %v5507_v6  ;;  %v5841_v52 = vrot.slane %v1267_v43, %v4246_v29  ;;  %v6678_v6 = vld [vmem:[#allocation51_spill] sm:$0xff]  ;;  %v6681_v23 = vld [vmem:[#allocation62_spill] sm:$0xff] }
 0x245   : > { %v3570_v42 = vsel %vm3565_vm3, %v3561_v2, %v5659_v33  ;;  %v5826_v15 = vpop.permute.xlu1 %3140  ;;  %v3203_v26 = vpop.permute.xlu0 %3202  ;;  %v6676_v33 = vld [vmem:[#allocation49_spill] sm:$0xff]  ;;  %v1831_v44 = vcombine.high %v5649_v32, %v5652_v39  ;;  %v5850_v47 = vrot.slane %v1402_v59, %v4246_v29  ;;  %v1851_v36 = vcombine.high %v6678_v6, %v6677_v50  ;;  %v6683_v59 = vld [vmem:[#allocation66_spill] sm:$0xff] }
 0x246   : > { %v5829_v34 = vsel %vm3574_vm4, %v3570_v42, %v3203_v26  ;;  %v5838_v19 = vrot.slane %v6674_v5, %v4246_v29  ;;  %v1835_v4 = vcombine.high %v6676_v33, %v6675_v10  ;;  %v1867_v43 = vcombine.high %v6680_v61, %v6679_v11 }
 0x247   : > { %3426 = vrot.lane.b32.xlu0 %v2374_v18, %s4012_s5  ;;  %3364 = vrot.lane.b32.xlu1 %v2508_v20, %s4010_s3  ;;  %v1883_v40 = vcombine.high %v6682_v14, %v6681_v23  ;;  %v1965_v2 = vcombine.high %v5655_v21, %v5666_v25  ;;  %v2866_v18 = vcombine.low %v5807_v12, %v5816_v37 }
 0x248   : > { %v2898_v32 = vcombine.low %v5819_v58, %v5822_v17  ;;  %v2987_v39 = vcombine.high %v5461_v35, %v5464_v28  ;;  %v3019_v20 = vcombine.high %v6683_v59, %v5470_v45  ;;  %v1422_v21 = vcombine.low %v5832_v1, %v5850_v47  ;;  %v6689_v59 = vld [vmem:[#allocation88_spill] sm:$0xff] }
 0x249   : > { %v3145_v42 = vpop.permute.xlu1 %3144  ;;  %v3207_v26 = vpop.permute.xlu0 %3206  ;;  %v1288_v25 = vcombine.low %v5838_v19, %v5841_v52  ;;  %v5877_v35 = vrot.slane %v1835_v4, %v4207_v57  ;;  %v5880_v45 = vrot.slane %v1851_v36, %v4207_v57  ;;  %v5883_v28 = vrot.slane %v1867_v43, %v4207_v57 }
 0x24a   : > { %v3581_v5 = vsel %vm3574_vm4, %v5714_v22, %v3207_v26  ;;  %v5886_v22 = vrot.slane %v1883_v40, %v4207_v57  ;;  %v5892_v50 = vrot.slane %v3019_v20, %v4246_v29  ;;  %v5895_v4 = vrot.slane %v2866_v18, %v4246_v29  ;;  %v6685_v18 = vld [vmem:[#allocation84_spill] sm:$0xff]  ;;  %v6690_v20 = vld [vmem:[#allocation86_spill] sm:$0xff] }
 0x24b   : > { %3392 = vrot.lane.b32.xlu1 %v1965_v2, %s4011_s4  ;;  %3454 = vrot.lane.b32.xlu0 %v1831_v44, %s4013_s6  ;;  %6684 = vst [vmem:[#allocation59_spill] sm:$0xff] %v5883_v28  ;;  %v5889_v44 = vrot.slane %v2987_v39, %v4246_v29  ;;  %v5898_v6 = vrot.slane %v2898_v32, %v4246_v29  ;;  %v6687_v32 = vld [vmem:[#allocation85_spill] sm:$0xff] }
 0x24c   : > { %v1779_v11 = vcombine.high %v5592_v13, %v5595_v38  ;;  %v1811_v61 = vcombine.high %v5598_v56, %v5601_v31  ;;  %v1914_v43 = vcombine.low %v5877_v35, %v5880_v45  ;;  %v1946_v23 = vcombine.low %v5883_v28, %v5886_v22  ;;  %v6686_v13 = vld [vmem:[#allocation80_spill] sm:$0xff]  ;;  %v6688_v56 = vld [vmem:[#allocation81_spill] sm:$0xff] }
 0x24d   : > { %v3165_v10 = vpop.permute.xlu1 %3164  ;;  %v3227_v33 = vpop.permute.xlu0 %3226  ;;  %v3052_v40 = vcombine.low %v5889_v44, %v5892_v50  ;;  %v2918_v2 = vcombine.low %v5895_v4, %v5898_v6  ;;  %v2379_v38 = vcombine.high %v6686_v13, %v6685_v18  ;;  %v2395_v31 = vcombine.high %v6688_v56, %v6687_v32 }
 0x24e   : > { %v5902_v36 = vsel %vm3583_vm5, %v5752_v30, %v3227_v33  ;;  %v2411_v26 = vcombine.high %v6690_v20, %v6689_v59  ;;  %v5935_v28 = vrot.slane %v1779_v11, %v4246_v29  ;;  %v5938_v18 = vrot.slane %v1811_v61, %v4246_v29 }
 0x24f   : > { %3420 = vrot.lane.b32.xlu1 %v1422_v21, %s4012_s5  ;;  %3482 = vrot.lane.b32.xlu0 %v1288_v25, %s4014_s12  ;;  %v6691_v21 = vld [vmem:[#allocation91_spill] sm:$0xff]  ;;  %v2375_v32 = vcombine.high %v5755_v48, %v5758_v16  ;;  %v5947_v56 = vrot.slane %v1914_v43, %v4246_v29  ;;  %v5953_v11 = vrot.slane %v2379_v38, %v4207_v57  ;;  %v6693_v16 = vld [vmem:[#allocation89_spill] sm:$0xff] }
 0x250   : > { %v6692_v25 = vld [vmem:[#allocation87_spill] sm:$0xff]  ;;  %v5956_v61 = vrot.slane %v2395_v31, %v4207_v57  ;;  %v2323_v38 = vcombine.high %v5669_v49, %v5672_v41 }
 0x251   : > { %v5914_v14 = vpop.permute.xlu1 %3168  ;;  %v3231_v30 = vpop.permute.xlu0 %3230  ;;  %v2427_v33 = vcombine.high %v6692_v25, %v6691_v21  ;;  %v2355_v21 = vcombine.high %v5675_v24, %v5678_v9  ;;  %v6696_v25 = vld [vmem:[#allocation63_spill] sm:$0xff] }
 0x252   : > { %v5926_v39 = vsel %vm3583_vm5, %v5798_v7, %v3231_v30  ;;  %v2509_v30 = vcombine.high %v5765_v8, %v5768_v55  ;;  %v5963_v8 = vrot.slane %v2411_v26, %v4207_v57  ;;  %v6694_v55 = vld [vmem:[#allocation90_spill] sm:$0xff] }
 0x253   : > { %3368 = vrot.lane.b32.xlu1 %v3052_v40, %s4010_s3  ;;  %3430 = vrot.lane.b32.xlu0 %v2918_v2, %s4012_s5  ;;  %v5950_v40 = vrot.slane %v1946_v23, %v4246_v29  ;;  %v5966_v48 = vrot.slane %v2427_v33, %v4207_v57  ;;  %v6695_v43 = vcombine.low %v6693_v16, %v6694_v55  ;;  %v6697_v33 = vld [vmem:[#allocation29_spill] sm:$0xff] }
 0x254   : > { %v1371_v16 = vcombine.high %v5725_v53, %v5728_v63  ;;  %v6030_v63 = vrot.slane %v2355_v21, %v4246_v29  ;;  %v6707_v21 = vld [vmem:[#allocation14_spill] sm:$0xff] }
 0x255   : > { %v5940_v13 = vpop.permute.xlu1 %3172  ;;  %v3235_v7 = vpop.permute.xlu0 %3234  ;;  %v3546_v23 = vsel %vm3538_vm0, %v6695_v43, %v5578_v3  ;;  %v1966_v26 = vcombine.low %v5947_v56, %v5950_v40  ;;  %v1832_v3 = vcombine.low %v5935_v28, %v5938_v18 }
 0x256   : > { %v5960_v2 = vsel %vm3583_vm5, %v5829_v34, %v3235_v7  ;;  %v3555_v34 = vsel %vm3547_vm1, %v3546_v23, %v5698_v27  ;;  %v6698_v7 = vld [vmem:[#allocation30_spill] sm:$0xff] }
 0x257   : > { %3396 = vrot.lane.b32.xlu1 %v2509_v30, %s4011_s4  ;;  %3458 = vrot.lane.b32.xlu0 %v2375_v32, %s4013_s6  ;;  %v3564_v31 = vsel %vm3556_vm2, %v3555_v34, %v3145_v42  ;;  %v6699_v27 = vcombine.low %v6697_v33, %v6698_v7  ;;  %v2458_v42 = vcombine.low %v5953_v11, %v5956_v61  ;;  %v6708_v7 = vld [vmem:[#allocation36_spill] sm:$0xff] }
 0x258   : > { %v2490_v32 = vcombine.low %v5963_v8, %v5966_v48  ;;  %v6015_v34 = vrot.slane %v2323_v38, %v4246_v29  ;;  %v2919_v33 = vcombine.high %v5895_v4, %v5898_v6  ;;  %v6714_v4 = vld [vmem:[#allocation76_spill] sm:$0xff] }
 0x259   : > { %v3177_v59 = vpop.permute.xlu1 %3176  ;;  %v3239_v20 = vpop.permute.xlu0 %3238  ;;  %v3540_v30 = vsel %vm3538_vm0, %v6699_v27, %v6696_v25  ;;  %v6709_v27 = vld [vmem:[#allocation48_spill] sm:$0xff] }
 0x25a   : > { %v5992_v49 = vsel %vm3565_vm3, %v3564_v31, %v3177_v59  ;;  %v5995_v41 = vsel %vm3583_vm5, %v3581_v5, %v3239_v20  ;;  %v3549_v24 = vsel %vm3547_vm1, %v3540_v30, %v5603_v60  ;;  %v1289_v5 = vcombine.high %v5838_v19, %v5841_v52  ;;  %v6700_v31 = vld [vmem:[#allocation71_spill] sm:$0xff]  ;;  %v6701_v59 = vld [vmem:[#allocation52_spill] sm:$0xff]  ;;  %v6702_v20 = vld [vmem:[#allocation53_spill] sm:$0xff] }
 0x25b   : > { %3424 = vrot.lane.b32.xlu1 %v1966_v26, %s4012_s5  ;;  %3486 = vrot.lane.b32.xlu0 %v1832_v3, %s4014_s12  ;;  %v3558_v9 = vsel %vm3556_vm2, %v3549_v24, %v5742_v62  ;;  %v1423_v60 = vcombine.high %v5832_v1, %v5850_v47  ;;  %v6703_v62 = vcombine.low %v6701_v59, %v6702_v20  ;;  %v6706_v3 = vld [vmem:[#allocation43_spill] sm:$0xff]  ;;  %v6711_v24 = vld [vmem:[#allocation41_spill] sm:$0xff] }
 0x25c   : > { %v3567_v55 = vsel %vm3565_vm3, %v3558_v9, %v3165_v10  ;;  %v6037_v52 = vrot.slane %v2458_v42, %v4246_v29  ;;  %v6040_v47 = vrot.slane %v2490_v32, %v4246_v29  ;;  %v6704_v10 = vld [vmem:[#allocation50_spill] sm:$0xff]  ;;  %v2939_v25 = vcombine.high %v6707_v21, %v6706_v3  ;;  %v6710_v42 = vld [vmem:[#allocation73_spill] sm:$0xff] }
 0x25d   : > { %v3197_v43 = vpop.permute.xlu1 %3196  ;;  %v3259_v23 = vpop.permute.xlu0 %3258  ;;  %v3542_v26 = vsel %vm3538_vm0, %v6703_v62, %v6700_v31  ;;  %v2955_v30 = vcombine.high %v6709_v27, %v6708_v7  ;;  %v2971_v9 = vcombine.high %v6711_v24, %v6710_v42  ;;  %v1385_v3 = vrot.slane %v1371_v16, %v4246_v29 }
 0x25e   : > { %v6023_v19 = vsel %vm3574_vm4, %v3567_v55, %v3197_v43  ;;  %v6027_v53 = vsel %vm3592_vm6, %v5902_v36, %v3259_v23  ;;  %v3551_v1 = vsel %vm3547_vm1, %v3542_v26, %v5628_v54  ;;  %v6705_v36 = vld [vmem:[#allocation20_spill] sm:$0xff]  ;;  %v3053_v43 = vcombine.high %v5889_v44, %v5892_v50 }
 0x25f   : > { %3452 = vrot.lane.b32.xlu1 %v1423_v60, %s4013_s6  ;;  %3514 = vrot.lane.b32.xlu0 %v1289_v5, %s4015_s14  ;;  %v2923_v38 = vcombine.high %v6705_v36, %v6704_v10  ;;  %v3560_v54 = vsel %vm3556_vm2, %v3551_v1, %v5782_v51  ;;  %v1403_v51 = vcombine.high %v5735_v0, %v5738_v46  ;;  %v6712_v23 = vld [vmem:[#allocation68_spill] sm:$0xff]  ;;  %v6713_v60 = vld [vmem:[#allocation75_spill] sm:$0xff] }
 0x260   : > { %v3569_v32 = vsel %vm3565_vm3, %v3560_v54, %v5914_v14  ;;  %v6715_v6 = vcombine.low %v6713_v60, %v6714_v4  ;;  %v6716_v14 = vld [vmem:[#allocation64_spill] sm:$0xff]  ;;  %v2510_v0 = vcombine.low %v6037_v52, %v6040_v47  ;;  %v2376_v46 = vcombine.low %v6015_v34, %v6030_v63 }
 0x261   : > { %v3201_v5 = vpop.permute.xlu1 %3200  ;;  %v3263_v55 = vpop.permute.xlu0 %3262  ;;  %v2867_v44 = vcombine.high %v5807_v12, %v5816_v37  ;;  %v2899_v50 = vcombine.high %v5819_v58, %v5822_v17  ;;  %v6086_v1 = vrot.slane %v2939_v25, %v4207_v57  ;;  %v6089_v10 = vrot.slane %v2955_v30, %v4207_v57 }
 0x262   : > { %v3544_v31 = vsel %vm3538_vm0, %v6715_v6, %v6712_v23  ;;  %v3578_v59 = vsel %vm3574_vm4, %v3569_v32, %v3201_v5  ;;  %v3595_v20 = vsel %vm3592_vm6, %v5926_v39, %v3263_v55  ;;  %v6081_v39 = vrot.slane %v2923_v38, %v4207_v57 }
 0x263   : > { %v3553_v62 = vsel %vm3547_vm1, %v3544_v31, %v6716_v14  ;;  %3400 = vrot.lane.b32.xlu1 %v3053_v43, %s4011_s4  ;;  %3462 = vrot.lane.b32.xlu0 %v2919_v33, %s4013_s6  ;;  %v6092_v36 = vrot.slane %v2971_v9, %v4207_v57  ;;  %v1833_v57 = vcombine.high %v5935_v28, %v5938_v18  ;;  %v6717_v9 = vld [vmem:[#allocation59_spill] sm:$0xff]  ;;  %vm3714_vm0 = vcmask 523264  }
 0x264   : > { %v3562_v26 = vsel %vm3556_vm2, %v3553_v62, %v5826_v15  ;;  %v1967_v15 = vcombine.high %v5947_v56, %v5950_v40  ;;  %v3002_v21 = vcombine.low %v6081_v39, %v6086_v1  ;;  %v2881_v33 = vrot.slane %v2867_v44, %v4246_v29 }
 0x265   : > { %v3571_v12 = vsel %vm3565_vm3, %v3562_v26, %v5940_v13  ;;  %v3205_v37 = vpop.permute.xlu1 %3204  ;;  %v3267_v58 = vpop.permute.xlu0 %3266  ;;  %v1417_v13 = vrot.slane %v1403_v51, %v4246_v29  ;;  %v2913_v7 = vrot.slane %v2899_v50, %v4246_v29  ;;  %v1947_v32 = vcombine.high %v6717_v9, %v5886_v22 }
 0x266   : > { %v3580_v17 = vsel %vm3574_vm4, %v3571_v12, %v3205_v37  ;;  %v3597_v38 = vsel %vm3592_vm6, %v5960_v2, %v3267_v58  ;;  %v3034_v2 = vcombine.low %v6089_v10, %v6092_v36  ;;  %v3010_v30 = vrot.slane %v3002_v21, %v4246_v29 }
 0x267   : > { %3428 = vrot.lane.b32.xlu1 %v2510_v0, %s4012_s5  ;;  %3490 = vrot.lane.b32.xlu0 %v2376_v46, %s4014_s12  ;;  %v1424_v16 = vcombine.low %v1385_v3, %v1417_v13  ;;  %v2920_v27 = vcombine.low %v2881_v33, %v2913_v7  ;;  %v2377_v51 = vcombine.high %v6015_v34, %v6030_v63 }
 0x268   : > { %v3042_v42 = vrot.slane %v3034_v2, %v4246_v29  ;;  %v1961_v4 = vrot.slane %v1947_v32, %v4246_v29  ;;  %v2491_v14 = vcombine.high %v5963_v8, %v5966_v48  ;;  %v1425_v46 = vcombine.high %v1385_v3, %v1417_v13 }
 0x269   : > { %v3209_v25 = vpop.permute.xlu1 %3208  ;;  %v3271_v54 = vpop.permute.xlu0 %3270  ;;  %v3003_v8 = vcombine.high %v6081_v39, %v6086_v1  ;;  %v3035_v48 = vcombine.high %v6089_v10, %v6092_v36 }
 0x26a   : > { %v3582_v56 = vsel %vm3574_vm4, %v5992_v49, %v3209_v25  ;;  %v3599_v28 = vsel %vm3592_vm6, %v5995_v41, %v3271_v54  ;;  %v1915_v41 = vcombine.high %v5877_v35, %v5880_v45  ;;  %v3054_v43 = vcombine.low %v3010_v30, %v3042_v42 }
 0x26b   : > { %3456 = vrot.lane.b32.xlu1 %v1967_v15, %s4013_s6  ;;  %3518 = vrot.lane.b32.xlu0 %v1833_v57, %s4015_s14  ;;  %v2511_v35 = vcombine.high %v6037_v52, %v6040_v47  ;;  %v2921_v45 = vcombine.high %v2881_v33, %v2913_v7  ;;  %v2459_v47 = vcombine.high %v5953_v11, %v5956_v61 }
 0x26c   : > { %v1929_v22 = vrot.slane %v1915_v41, %v4246_v29  ;;  %v3055_v37 = vcombine.high %v3010_v30, %v3042_v42  ;;  %v3017_v54 = vrot.slane %v3003_v8, %v4246_v29  ;;  %v3049_v39 = vrot.slane %v3035_v48, %v4246_v29 }
 0x26d   : > { %v3229_v18 = vpop.permute.xlu1 %3228  ;;  %v3291_v40 = vpop.permute.xlu0 %3290  ;;  %v2473_v58 = vrot.slane %v2459_v47, %v4246_v29 }
 0x26e   : > { %v3585_v24 = vsel %vm3583_vm5, %v6023_v19, %v3229_v18  ;;  %v3602_v49 = vsel %vm3601_vm7, %v6027_v53, %v3291_v40  ;;  %v1969_v25 = vcombine.high %v1929_v22, %v1961_v4  ;;  %v3056_v7 = vcombine.low %v3017_v54, %v3049_v39 }
 0x26f   : > { %3484 = vrot.lane.b32.xlu1 %v1424_v16, %s4014_s12  ;;  %3494 = vrot.lane.b32.xlu0 %v2920_v27, %s4014_s12  ;;  %v3057_v42 = vcombine.high %v3017_v54, %v3049_v39 }
 0x271   : > { %v3233_v5 = vpop.permute.xlu1 %3232  ;;  %v3295_v55 = vpop.permute.xlu0 %3294 }
 0x272   : > { %v3587_v19 = vsel %vm3583_vm5, %v3578_v59, %v3233_v5  ;;  %v3604_v53 = vsel %vm3601_vm7, %v3595_v20, %v3295_v55  ;;  %v1968_v59 = vcombine.low %v1929_v22, %v1961_v4 }
 0x273   : > { %3432 = vrot.lane.b32.xlu1 %v3054_v43, %s4012_s5  ;;  %3522 = vrot.lane.b32.xlu0 %v2377_v51, %s4015_s14 }
 0x275   : > { %v3237_v23 = vpop.permute.xlu1 %3236  ;;  %v3299_v60 = vpop.permute.xlu0 %3298 }
 0x276   : > { %v3589_v34 = vsel %vm3583_vm5, %v3580_v17, %v3237_v23  ;;  %v3606_v63 = vsel %vm3601_vm7, %v3597_v38, %v3299_v60  ;;  %v2505_v17 = vrot.slane %v2491_v14, %v4246_v29 }
 0x277   : > { %3460 = vrot.lane.b32.xlu1 %v2511_v35, %s4013_s6  ;;  %3526 = vrot.lane.b32.xlu0 %v2921_v45, %s4015_s14 }
 0x278   : > { %v2512_v57 = vcombine.low %v2473_v58, %v2505_v17  ;;  %v2513_v16 = vcombine.high %v2473_v58, %v2505_v17 }
 0x279   : > { %v3241_v6 = vpop.permute.xlu1 %3240  ;;  %v3303_v31 = vpop.permute.xlu0 %3302 }
 0x27a   : > { %v3591_v20 = vsel %vm3583_vm5, %v3582_v56, %v3241_v6  ;;  %v3608_v52 = vsel %vm3601_vm7, %v3599_v28, %v3303_v31 }
 0x27b   : > { %3488 = vrot.lane.b32.xlu1 %v1968_v59, %s4014_s12 }
 0x27d   : > { %v3261_v62 = vpop.permute.xlu1 %3260  ;;  %v3323_v0 = vpop.permute.xlu0 %3322 }
 0x27e   : > { %v3594_v44 = vsel %vm3592_vm6, %v3585_v24, %v3261_v62  ;;  %v3611_v50 = vsel %vm3610_vm8, %v3602_v49, %v3323_v0 }
 0x27f   : > { %3516 = vrot.lane.b32.xlu1 %v1425_v46, %s4015_s14 }
 0x281   : > { %v3265_v26 = vpop.permute.xlu1 %3264  ;;  %v3327_v12 = vpop.permute.xlu0 %3326 }
 0x282   : > { %v3596_v11 = vsel %vm3592_vm6, %v3587_v19, %v3265_v26  ;;  %v3613_v61 = vsel %vm3610_vm8, %v3604_v53, %v3327_v12 }
 0x283   : > { %3464 = vrot.lane.b32.xlu1 %v3055_v37, %s4013_s6 }
 0x285   : > { %v3269_v38 = vpop.permute.xlu1 %3268  ;;  %v3355_v15 = vpop.permute.xlu0 %3354 }
 0x286   : > { %v3598_v3 = vsel %vm3592_vm6, %v3589_v34, %v3269_v38  ;;  %v6166_v13 = vsel %vm3619_vm9, %v3611_v50, %v3355_v15 }
 0x287   : > { %3492 = vrot.lane.b32.xlu1 %v2512_v57, %s4014_s12 }
 0x289   : > { %v3273_v21 = vpop.permute.xlu1 %3272  ;;  %v3331_v2 = vpop.permute.xlu0 %3330 }
 0x28a   : > { %v3600_v1 = vsel %vm3592_vm6, %v3591_v20, %v3273_v21  ;;  %v3615_v10 = vsel %vm3610_vm8, %v3606_v63, %v3331_v2 }
 0x28b   : > { %3520 = vrot.lane.b32.xlu1 %v1969_v25, %s4015_s14 }
 0x28d   : > { %v3293_v36 = vpop.permute.xlu1 %3292  ;;  %v3359_v33 = vpop.permute.xlu0 %3358 }
 0x28e   : > { %v3603_v56 = vsel %vm3601_vm7, %v3594_v44, %v3293_v36  ;;  %v6176_v28 = vsel %vm3619_vm9, %v3613_v61, %v3359_v33 }
 0x28f   : > { %3496 = vrot.lane.b32.xlu1 %v3056_v7, %s4014_s12 }
 0x291   : > { %v3297_v18 = vpop.permute.xlu1 %3296  ;;  %v3387_v40 = vpop.permute.xlu0 %3386 }
 0x292   : > { %v3605_v29 = vsel %vm3601_vm7, %v3596_v11, %v3297_v18  ;;  %v3629_v48 = vsel %vm3628_vm10, %v6166_v13, %v3387_v40 }
 0x293   : > { %3524 = vrot.lane.b32.xlu1 %v2513_v16, %s4015_s14 }
 0x295   : > { %v3301_v27 = vpop.permute.xlu1 %3300  ;;  %v3335_v30 = vpop.permute.xlu0 %3334 }
 0x296   : > { %v3607_v24 = vsel %vm3601_vm7, %v3598_v3, %v3301_v27  ;;  %v6183_v49 = vsel %vm3610_vm8, %v3608_v52, %v3335_v30 }
 0x297   : > { %3528 = vrot.lane.b32.xlu1 %v3057_v42, %s4015_s14 }
 0x299   : > { %v3305_v41 = vpop.permute.xlu1 %3304  ;;  %v3363_v9 = vpop.permute.xlu0 %3362 }
 0x29a   : > { %v3609_v32 = vsel %vm3601_vm7, %v3600_v1, %v3305_v41  ;;  %v6188_v5 = vsel %vm3619_vm9, %v3615_v10, %v3363_v9 }
 0x29d   : > { %v3325_v55 = vpop.permute.xlu1 %3324  ;;  %v3391_v43 = vpop.permute.xlu0 %3390 }
 0x29e   : > { %v3612_v51 = vsel %vm3610_vm8, %v3603_v56, %v3325_v55  ;;  %v3631_v1 = vsel %vm3628_vm10, %v6176_v28, %v3391_v43 }
 0x2a1   : > { %v3329_v19 = vpop.permute.xlu1 %3328  ;;  %v3419_v53 = vpop.permute.xlu0 %3418 }
 0x2a2   : > { %v3614_v23 = vsel %vm3610_vm8, %v3605_v29, %v3329_v19  ;;  %v3638_v38 = vsel %vm3637_vm11, %v3629_v48, %v3419_v53 }
 0x2a5   : > { %v3357_v60 = vpop.permute.xlu1 %3356  ;;  %v3367_v35 = vpop.permute.xlu0 %3366 }
 0x2a6   : > { %v6193_v45 = vsel %vm3619_vm9, %v3612_v51, %v3357_v60  ;;  %v3626_v30 = vsel %vm3619_vm9, %v6183_v49, %v3367_v35 }
 0x2a9   : > { %v3333_v22 = vpop.permute.xlu1 %3332  ;;  %v3395_v4 = vpop.permute.xlu0 %3394 }
 0x2aa   : > { %v3616_v34 = vsel %vm3610_vm8, %v3607_v24, %v3333_v22  ;;  %v3633_v29 = vsel %vm3628_vm10, %v6188_v5, %v3395_v4 }
 0x2ad   : > { %v3361_v63 = vpop.permute.xlu1 %3360  ;;  %v3423_v6 = vpop.permute.xlu0 %3422 }
 0x2ae   : > { %v6197_v31 = vsel %vm3619_vm9, %v3614_v23, %v3361_v63  ;;  %v3640_v10 = vsel %vm3637_vm11, %v3631_v1, %v3423_v6 }
 0x2b1   : > { %v6199_v59 = vpop.permute.xlu1 %3388  ;;  %v3451_v20 = vpop.permute.xlu0 %3450 }
 0x2b2   : > { %v3647_v15 = vsel %vm3646_vm12, %v3638_v38, %v3451_v20  ;;  %v3630_v23 = vsel %vm3628_vm10, %v6193_v45, %v6199_v59 }
 0x2b5   : > { %v3337_v52 = vpop.permute.xlu1 %3336  ;;  %v3399_v47 = vpop.permute.xlu0 %3398 }
 0x2b6   : > { %v6202_v14 = vsel %vm3610_vm8, %v3609_v32, %v3337_v52  ;;  %v3635_v9 = vsel %vm3628_vm10, %v3626_v30, %v3399_v47 }
 0x2b9   : > { %v3365_v62 = vpop.permute.xlu1 %3364  ;;  %v3427_v0 = vpop.permute.xlu0 %3426 }
 0x2ba   : > { %v6205_v46 = vsel %vm3619_vm9, %v3616_v34, %v3365_v62  ;;  %v3642_v28 = vsel %vm3637_vm11, %v3633_v29, %v3427_v0 }
 0x2bd   : > { %v6207_v44 = vpop.permute.xlu1 %3392  ;;  %v3455_v50 = vpop.permute.xlu0 %3454 }
 0x2be   : > { %v3649_v36 = vsel %vm3646_vm12, %v3640_v10, %v3455_v50  ;;  %v3632_v20 = vsel %vm3628_vm10, %v6197_v31, %v6207_v44 }
 0x2c1   : > { %v3421_v26 = vpop.permute.xlu1 %3420  ;;  %v3483_v12 = vpop.permute.xlu0 %3482 }
 0x2c2   : > { %v3656_v57 = vsel %vm3655_vm13, %v3647_v15, %v3483_v12  ;;  %v3639_v60 = vsel %vm3637_vm11, %v3630_v23, %v3421_v26 }
 0x2c5   : > { %v6209_v37 = vpop.permute.xlu1 %3368  ;;  %v3431_v58 = vpop.permute.xlu0 %3430 }
 0x2c6   : > { %v3644_v55 = vsel %vm3637_vm11, %v3635_v9, %v3431_v58  ;;  %v3627_v44 = vsel %vm3619_vm9, %v6202_v14, %v6209_v37 }
 0x2c9   : > { %v6211_v17 = vpop.permute.xlu1 %3396  ;;  %v3459_v11 = vpop.permute.xlu0 %3458 }
 0x2ca   : > { %v3651_v27 = vsel %vm3646_vm12, %v3642_v28, %v3459_v11  ;;  %v3634_v50 = vsel %vm3628_vm10, %v6205_v46, %v6211_v17 }
 0x2cd   : > { %v3425_v61 = vpop.permute.xlu1 %3424  ;;  %v3487_v8 = vpop.permute.xlu0 %3486 }
 0x2ce   : > { %v3658_v33 = vsel %vm3655_vm13, %v3649_v36, %v3487_v8  ;;  %v3641_v52 = vsel %vm3637_vm11, %v3632_v20, %v3425_v61 }
 0x2d1   : > { %v3453_v3 = vpop.permute.xlu1 %3452  ;;  %v3515_v21 = vpop.permute.xlu0 %3514 }
 0x2d2   : > { %v6219_v2 = vsel %vm3664_vm14, %v3656_v57, %v3515_v21  ;;  %v3648_v35 = vsel %vm3646_vm12, %v3639_v60, %v3453_v3 }
 0x2d3   : > { %3681 = vrot.lane.b32.xlu0 %v6219_v2, %s4016_s15 }
 0x2d5   : > { %v3401_v25 = vpop.permute.xlu1 %3400  ;;  %v3463_v54 = vpop.permute.xlu0 %3462 }
 0x2d6   : > { %v3653_v5 = vsel %vm3646_vm12, %v3644_v55, %v3463_v54  ;;  %v3636_v11 = vsel %vm3628_vm10, %v3627_v44, %v3401_v25 }
 0x2d9   : > { %v3429_v13 = vpop.permute.xlu1 %3428  ;;  %v3491_v39 = vpop.permute.xlu0 %3490 }
 0x2da   : > { %v3660_v42 = vsel %vm3655_vm13, %v3651_v27, %v3491_v39  ;;  %v3643_v26 = vsel %vm3637_vm11, %v3634_v50, %v3429_v13 }
 0x2dd   : > { %v3457_v7 = vpop.permute.xlu1 %3456  ;;  %v3519_v56 = vpop.permute.xlu0 %3518 }
 0x2de   : > { %v6229_v18 = vsel %vm3664_vm14, %v3658_v33, %v3519_v56  ;;  %v3650_v45 = vsel %vm3646_vm12, %v3641_v52, %v3457_v7 }
 0x2df   : > { %3685 = vrot.lane.b32.xlu0 %v6229_v18, %s4016_s15 }
 0x2e1   : > { %v3485_v40 = vpop.permute.xlu1 %3484  ;;  %v3495_v16 = vpop.permute.xlu0 %3494 }
 0x2e2   : > { %v3662_v43 = vsel %vm3655_vm13, %v3653_v5, %v3495_v16  ;;  %v3657_v22 = vsel %vm3655_vm13, %v3648_v35, %v3485_v40 }
 0x2e5   : > { %v3433_v24 = vpop.permute.xlu1 %3432  ;;  %v3523_v41 = vpop.permute.xlu0 %3522 }
 0x2e6   : > { %v3669_v32 = vsel %vm3664_vm14, %v3660_v42, %v3523_v41  ;;  %v3645_v8 = vsel %vm3637_vm11, %v3636_v11, %v3433_v24 }
 0x2e7   : > { %3689 = vrot.lane.b32.xlu0 %v3669_v32, %s4016_s15 }
 0x2e9   : > { %v3461_v51 = vpop.permute.xlu1 %3460  ;;  %v3527_v19 = vpop.permute.xlu0 %3526 }
 0x2ea   : > { %v3671_v49 = vsel %vm3664_vm14, %v3662_v43, %v3527_v19  ;;  %v3652_v31 = vsel %vm3646_vm12, %v3643_v26, %v3461_v51 }
 0x2eb   : > { %3693 = vrot.lane.b32.xlu0 %v3671_v49, %s4016_s15 }
 0x2ed   : > { %v3489_v53 = vpop.permute.xlu1 %3488 }
 0x2ee   : > { %v3659_v59 = vsel %vm3655_vm13, %v3650_v45, %v3489_v53 }
 0x2f1   : > { %v3517_v4 = vpop.permute.xlu1 %3516 }
 0x2f2   : > { %v3666_v34 = vsel %vm3664_vm14, %v3657_v22, %v3517_v4 }
 0x2f3   : > { %3683 = vrot.lane.b32.xlu1 %v3666_v34, %s4016_s15 }
 0x2f5   : > { %v3465_v63 = vpop.permute.xlu1 %3464 }
 0x2f6   : > { %v3654_v46 = vsel %vm3646_vm12, %v3645_v8, %v3465_v63 }
 0x2f9   : > { %v3493_v6 = vpop.permute.xlu1 %3492 }
 0x2fa   : > { %v3661_v12 = vsel %vm3655_vm13, %v3652_v31, %v3493_v6 }
 0x2fd   : > { %v3521_v47 = vpop.permute.xlu1 %3520 }
 0x2fe   : > { %v3668_v62 = vsel %vm3664_vm14, %v3659_v59, %v3521_v47 }
 0x2ff   : > { %3687 = vrot.lane.b32.xlu1 %v3668_v62, %s4016_s15 }
 0x301   : > { %v3497_v0 = vpop.permute.xlu1 %3496 }
 0x302   : > { %v3663_v17 = vsel %vm3655_vm13, %v3654_v46, %v3497_v0 }
 0x305   : > { %v3525_v58 = vpop.permute.xlu1 %3524 }
 0x306   : > { %v3670_v61 = vsel %vm3664_vm14, %v3661_v12, %v3525_v58 }
 0x307   : > { %3691 = vrot.lane.b32.xlu1 %v3670_v61, %s4016_s15 }
 0x309   : > { %v3529_v48 = vpop.permute.xlu1 %3528 }
 0x30a   : > { %v3672_v38 = vsel %vm3664_vm14, %v3663_v17, %v3529_v48 }
 0x30b   : > { %3695 = vrot.lane.b32.xlu1 %v3672_v38, %s4016_s15 }
 0x345   : > { %v3682_v14 = vpop.permute.xlu0 %3681 }
 0x346   : > { %v3706_v37 = vsel %vm3705_vm15, %v6219_v2, %v3682_v14 }
 0x347   : > { %3715 = vst.msk [vmem:[%s167_s22] sm:$0xff] %vm3714_vm0, %v3706_v37 }
 0x351   : > { %v3686_v15 = vpop.permute.xlu0 %3685 }
 0x352   : > { %v3708_v57 = vsel %vm3705_vm15, %v6229_v18, %v3686_v15 }
 0x353   : > { %3717 = vst.msk [vmem:[%s167_s22 + $0x10] sm:$0xff] %vm3714_vm0, %v3708_v57 }
 0x359   : > { %v3690_v3 = vpop.permute.xlu0 %3689 }
 0x35a   : > { %v3710_v21 = vsel %vm3705_vm15, %v3669_v32, %v3690_v3 }
 0x35b   : > { %3719 = vst.msk [vmem:[%s167_s22 + $0x20] sm:$0xff] %vm3714_vm0, %v3710_v21 }
 0x35d   : > { %v3694_v25 = vpop.permute.xlu0 %3693 }
 0x35e   : > { %v3712_v54 = vsel %vm3705_vm15, %v3671_v49, %v3694_v25 }
 0x35f   : > { %3721 = vst.msk [vmem:[%s167_s22 + $0x30] sm:$0xff] %vm3714_vm0, %v3712_v54 }
 0x365   : > { %v3684_v13 = vpop.permute.xlu1 %3683 }
 0x366   : > { %v3707_v2 = vsel %vm3705_vm15, %v3666_v34, %v3684_v13 }
 0x367   : > { %3716 = vst.msk [vmem:[%s167_s22 + $0x8] sm:$0xff] %vm3714_vm0, %v3707_v2 }
 0x371   : > { %v3688_v39 = vpop.permute.xlu1 %3687 }
 0x372   : > { %v3709_v1 = vsel %vm3705_vm15, %v3668_v62, %v3688_v39 }
 0x373   : > { %3718 = vst.msk [vmem:[%s167_s22 + $0x18] sm:$0xff] %vm3714_vm0, %v3709_v1 }
 0x379   : > { %v3692_v10 = vpop.permute.xlu1 %3691 }
 0x37a   : > { %v3711_v36 = vsel %vm3705_vm15, %v3670_v61, %v3692_v10 }
 0x37b   : > { %3720 = vst.msk [vmem:[%s167_s22 + $0x28] sm:$0xff] %vm3714_vm0, %v3711_v36 }
 0x37d   : > { %v3696_v33 = vpop.permute.xlu1 %3695 }
 0x37e   : > { %v3713_v7 = vsel %vm3705_vm15, %v3672_v38, %v3696_v33 }
 0x37f   : > { %3722 = vst.msk [vmem:[%s167_s22 + $0x38] sm:$0xff] %vm3714_vm0, %v3713_v7 }
 0x380 PF: > { %s14_s11 = sadd.s32 1, %s3994_s11   ;;  %s6718_s6 = smov %s3978_s7 }
 0x381   : > { %p11_p9 = scmp.ge.s32.totalorder %s14_s11, 4   ;;  %s6719_s7 = smov %s3982_s8 }
 0x382   : > { %s6720_s8 = smov %s4076_s18  ;;  %s6721_s9 = smov %s3990_s10 }
 0x383   : > { %s6722_s10 = smov %s6724_s13  ;;  %13 = sbr.rel (!%p11_p9) target bundleno = 4 (0x4), region = 64 }
 0x38a   :  { %3756 = vsyncpa [#allocation3], 1 }
 0x38b   :  { %3758 = vsyncpa [#allocation3 + $0x1], 1 }

</bundles_post_ra>
